<compile_context>
chip_gen: v7x
topology: tpu7x:2x2x1
jax: 0.10.0
libtpu: 0.0.40
codegen_flags: <defaults>
</compile_context>

<pallas_src>
import functools

import jax
import jax.numpy as jnp
import numpy as np
from jax.experimental import pallas as pl
from jax.experimental.pallas import tpu as pltpu


_VMEM_SPEC = pl.BlockSpec(memory_space=pltpu.MemorySpace.VMEM)


# ------------------------------- fused kernel ------------------------------- #

def _fused_cnn_kernel(x_ref, wc_ref, bc_ref, w1_ref, b1_ref, w2_ref, b2_ref,
                      out_ref, flat_ref, *, k, dh, p_full, c_out):
    """normalize -> conv (single im2col dot) -> ReLU -> fc1 -> ReLU -> fc2 -> ReLU.

    x_ref : (C, W*H + pad)          f32  raw pixels, flattened spatial, zero tail-pad
    wc_ref: (Cout, k*k*C)           bf16 conv weight, column order (ki, kj, c)
    bc_ref: (Cout, 1)               f32
    w1_ref: (Cout*W*H, hidden)      bf16 fc1 weight scattered on padded grid (0 rows at invalid q)
    b1_ref: (1, hidden)             f32
    w2_ref: (hidden, hidden)        bf16 (already transposed: h1 @ w2)
    b2_ref: (1, hidden)             f32
    out_ref:(1, hidden)             f32
    flat_ref: (1, Cout*W*H)         f32  VMEM scratch for the channel-major flatten
    """
    # input normalization in f32 on the VPU
    xn = x_ref[...] * (1.0 / 255.0) + 1e-6                    # (C, P_full + pad)

    # in-register im2col: k*k statically shifted lane windows stacked on sublanes
    cols = []
    for ki in range(k):
        for kj in range(k):
            s = ki * dh + kj                                  # static lane shift
            cols.append(xn[:, s:s + p_full])                  # (C, P_full)
    im2col = jnp.concatenate(cols, axis=0).astype(jnp.bfloat16)   # (k*k*C, P_full)

    # conv as ONE accumulating MXU dot: (Cout, k*k*C) x (k*k*C, P_full)
    conv = jnp.dot(wc_ref[...], im2col, preferred_element_type=jnp.float32)
    conv = jnp.maximum(conv + bc_ref[...], 0.0)               # (Cout, P_full) f32

    # channel-major flatten through VMEM scratch; offsets are multiples of 256
    # (lane-aligned, unmasked stores).  Padded spatial columns hold garbage but
    # their fc1 weight rows are zero, so they contribute exactly 0.
    for c in range(c_out):
        flat_ref[:, c * p_full:(c + 1) * p_full] = conv[c:c + 1, :]
    flat = flat_ref[...].astype(jnp.bfloat16)                 # (1, Cout*P_full)

    # fc1 as ONE dot against the pre-scattered weight, then ReLU
    h1 = jnp.dot(flat, w1_ref[...], preferred_element_type=jnp.float32) + b1_ref[...]
    h1 = jnp.maximum(h1, 0.0)                                 # (1, hidden) f32

    # fc2 -> ReLU
    h2 = jnp.dot(h1.astype(jnp.bfloat16), w2_ref[...],
                 preferred_element_type=jnp.float32) + b2_ref[...]
    out_ref[...] = jnp.maximum(h2, 0.0)


# ------------------------- params (init + one-time prep) -------------------- #

def init_params(key, obs_shape, hidden_size, kernel_size=3, stride=1):
    assert stride == 1, "this reference config uses stride=1"
    C, W, H = obs_shape
    Cout = hidden_size // 2
    O1, O2 = W - kernel_size + stride, H - kernel_size + stride
    F = Cout * O1 * O2
    k1, k2, k3 = jax.random.split(key, 3)
    # deterministic synthetic init (gain-scaled normal); biases = 0, like init_(...)
    return {
        "conv_w": jax.random.normal(k1, (Cout, C, kernel_size, kernel_size), jnp.float32)
                  * (1.0 / np.sqrt(C * kernel_size * kernel_size)),
        "conv_b": jnp.zeros((Cout,), jnp.float32),
        "fc1_w": jax.random.normal(k2, (hidden_size, F), jnp.float32) * (1.0 / np.sqrt(F)),
        "fc1_b": jnp.zeros((hidden_size,), jnp.float32),
        "fc2_w": jax.random.normal(k3, (hidden_size, hidden_size), jnp.float32)
                 * (1.0 / np.sqrt(hidden_size)),
        "fc2_b": jnp.zeros((hidden_size,), jnp.float32),
    }


def prepare_params(params, obs_shape, kernel_size=3, stride=1):
    """One-time preprocessing hoisted out of the forward path (bf16 MXU weights)."""
    C, Dw, Dh = obs_shape
    k = kernel_size
    O1, O2 = Dw - k + stride, Dh - k + stride
    conv_w = params["conv_w"]                              # (Cout, C, k, k)
    Cout = conv_w.shape[0]
    hidden = params["fc1_w"].shape[0]

    # conv weight -> (Cout, k*k*C), column order (ki, kj, c) matching in-kernel im2col
    wc = jnp.transpose(conv_w, (0, 2, 3, 1)).reshape(Cout, k * k * C).astype(jnp.bfloat16)
    bc = params["conv_b"].reshape(Cout, 1).astype(jnp.float32)

    # fc1 weight (hidden, Cout*O1*O2) -> (Cout*Dw*Dh, hidden) scattered onto the
    # padded spatial grid; zero rows at positions the kernel's conv output does
    # not cover (they hold garbage, garbage * 0 = 0).
    w1 = params["fc1_w"].reshape(hidden, Cout, O1, O2)
    w1 = jnp.transpose(w1, (1, 2, 3, 0))                   # (Cout, O1, O2, hidden)
    w1_full = jnp.zeros((Cout, Dw, Dh, hidden), jnp.float32).at[:, :O1, :O2, :].set(w1)
    w1p = w1_full.reshape(Cout * Dw * Dh, hidden).astype(jnp.bfloat16)

    b1 = params["fc1_b"].reshape(1, hidden).astype(jnp.float32)
    w2 = jnp.transpose(params["fc2_w"]).astype(jnp.bfloat16)  # (hidden, hidden)
    b2 = params["fc2_b"].reshape(1, hidden).astype(jnp.float32)
    return {"wc": wc, "bc": bc, "w1": w1p, "b1": b1, "w2": w2, "b2": b2}


# --------------------------------- forward ---------------------------------- #

@functools.partial(jax.jit, static_argnames=("kernel_size",))
def cnn_layer_forward(x, prep, kernel_size=3):
    """Pallas implementation of CNNLayer.forward for one observation x: (C, W, H)."""
    C, Dw, Dh = x.shape
    k = kernel_size
    c_out = prep["wc"].shape[0]
    hidden = prep["b1"].shape[1]
    p_full = Dw * Dh
    pad = (k - 1) * Dh + (k - 1)        # max static lane shift used inside the kernel

    x_pad = jnp.pad(x.reshape(C, p_full), ((0, 0), (0, pad)))

    kernel = functools.partial(_fused_cnn_kernel, k=k, dh=Dh,
                               p_full=p_full, c_out=c_out)

    flops = 2 * (c_out * C * k * k * p_full + c_out * p_full * hidden + hidden * hidden)
    bytes_accessed = (x_pad.size * x_pad.dtype.itemsize
                      + sum(v.size * v.dtype.itemsize for v in prep.values())
                      + hidden * 4)

    out = pl.pallas_call(
        kernel,
        out_shape=jax.ShapeDtypeStruct((1, hidden), jnp.float32),
        in_specs=[_VMEM_SPEC] * 7,
        out_specs=_VMEM_SPEC,
        scratch_shapes=[pltpu.VMEM((1, c_out * p_full), jnp.float32)],
        cost_estimate=pl.CostEstimate(flops=flops, transcendentals=0,
                                      bytes_accessed=bytes_accessed),
    )(x_pad, prep["wc"], prep["bc"], prep["w1"], prep["b1"], prep["w2"], prep["b2"])

    return out.reshape(hidden)          # same as torch: shape (hidden,)


# ------------------------------ pure-JAX reference -------------------------- #

def reference_forward(x, params):
    xn = x / 255.0 + 1e-6
    conv = jax.lax.conv_general_dilated(
        xn[None], params["conv_w"], window_strides=(1, 1), padding="VALID",
        dimension_numbers=("NCHW", "OIHW", "NCHW"),
        precision=jax.lax.Precision.HIGHEST)[0]
    conv = jnp.maximum(conv + params["conv_b"][:, None, None], 0.0)
    flat = conv.reshape(-1)
    h1 = jnp.maximum(jnp.dot(params["fc1_w"], flat, precision="highest") + params["fc1_b"], 0.0)
    h2 = jnp.maximum(jnp.dot(params["fc2_w"], h1, precision="highest") + params["fc2_b"], 0.0)
    return h2


# ----------------------------------- main ----------------------------------- #

if __name__ == "__main__":
    # shapes consistent with the module: obs_shape=(C=4, W=16, H=16), hidden_size=32
    obs_shape = (4, 16, 16)
    hidden_size = 32

    key = jax.random.PRNGKey(0)
    pkey, xkey = jax.random.split(key)
    params = init_params(pkey, obs_shape, hidden_size)
    prep = prepare_params(params, obs_shape)     # one-time, outside the forward path

    # pixel-like input in [0, 255)
    x = jax.random.uniform(xkey, obs_shape, jnp.float32, minval=0.0, maxval=255.0)

    out = jax.block_until_ready(cnn_layer_forward(x, prep))
    ref = jax.block_until_ready(reference_forward(x, params))

    # bf16 MXU operands (f32 accumulation) vs f32 HIGHEST reference
    np.testing.assert_allclose(np.asarray(out), np.asarray(ref), rtol=2e-2, atol=2e-2)

    # TODO(synk): the module's debug print() calls and the batched use-case are
    # intentionally omitted (Flatten's view(-1) makes the module single-sample).
    print("KERNEL_OK")
</pallas_src>

<mosaic_0001>
module attributes {stable_mosaic.version = 11 : i64} {
  func.func @_fused_cnn_kernel(%arg0: memref<4x290xf32, #tpu.memory_space<vmem>>, %arg1: memref<16x36xbf16, #tpu.memory_space<vmem>>, %arg2: memref<16x1xf32, #tpu.memory_space<vmem>>, %arg3: memref<4096x32xbf16, #tpu.memory_space<vmem>>, %arg4: memref<1x32xf32, #tpu.memory_space<vmem>>, %arg5: memref<32x32xbf16, #tpu.memory_space<vmem>>, %arg6: memref<1x32xf32, #tpu.memory_space<vmem>>, %arg7: memref<1x32xf32, #tpu.memory_space<vmem>>, %arg8: memref<1x4096xf32, #tpu.memory_space<vmem>>) attributes {dimension_semantics = [], scalar_prefetch = 0 : i64, scratch_operands = 1 : i64, tpu.core_type = #tpu.core_type<tc>} {
    %c0 = arith.constant 0 : index
    %c0_0 = arith.constant 0 : index
    %0 = vector.load %arg0[%c0, %c0_0] : memref<4x290xf32, #tpu.memory_space<vmem>>, vector<4x290xf32>
    %cst = arith.constant 0.00392156886 : f32
    %1 = vector.broadcast %cst : f32 to vector<4x290xf32>
    %2 = arith.mulf %0, %1 : vector<4x290xf32>
    %cst_1 = arith.constant 9.99999997E-7 : f32
    %3 = vector.broadcast %cst_1 : f32 to vector<4x290xf32>
    %4 = arith.addf %2, %3 : vector<4x290xf32>
    %5 = vector.extract_strided_slice %4 {offsets = [0, 0], sizes = [4, 256], strides = [1, 1]} : vector<4x290xf32> to vector<4x256xf32>
    %6 = vector.extract_strided_slice %4 {offsets = [0, 1], sizes = [4, 256], strides = [1, 1]} : vector<4x290xf32> to vector<4x256xf32>
    %7 = vector.extract_strided_slice %4 {offsets = [0, 2], sizes = [4, 256], strides = [1, 1]} : vector<4x290xf32> to vector<4x256xf32>
    %8 = vector.extract_strided_slice %4 {offsets = [0, 16], sizes = [4, 256], strides = [1, 1]} : vector<4x290xf32> to vector<4x256xf32>
    %9 = vector.extract_strided_slice %4 {offsets = [0, 17], sizes = [4, 256], strides = [1, 1]} : vector<4x290xf32> to vector<4x256xf32>
    %10 = vector.extract_strided_slice %4 {offsets = [0, 18], sizes = [4, 256], strides = [1, 1]} : vector<4x290xf32> to vector<4x256xf32>
    %11 = vector.extract_strided_slice %4 {offsets = [0, 32], sizes = [4, 256], strides = [1, 1]} : vector<4x290xf32> to vector<4x256xf32>
    %12 = vector.extract_strided_slice %4 {offsets = [0, 33], sizes = [4, 256], strides = [1, 1]} : vector<4x290xf32> to vector<4x256xf32>
    %13 = vector.extract_strided_slice %4 {offsets = [0, 34], sizes = [4, 256], strides = [1, 1]} : vector<4x290xf32> to vector<4x256xf32>
    %14 = tpu.concatenate %5, %6, %7, %8, %9, %10, %11, %12, %13 in 0 : vector<4x256xf32>, vector<4x256xf32>, vector<4x256xf32>, vector<4x256xf32>, vector<4x256xf32>, vector<4x256xf32>, vector<4x256xf32>, vector<4x256xf32>, vector<4x256xf32> -> vector<36x256xf32>
    %15 = arith.truncf %14 : vector<36x256xf32> to vector<36x256xbf16>
    %c0_2 = arith.constant 0 : index
    %c0_3 = arith.constant 0 : index
    %16 = vector.load %arg1[%c0_2, %c0_3] : memref<16x36xbf16, #tpu.memory_space<vmem>>, vector<16x36xbf16>
    %cst_4 = arith.constant dense<0.000000e+00> : vector<16x256xf32>
    %17 = tpu.matmul %16, %15, %cst_4 {dimension_numbers = #tpu.dot_dimension_numbers<[1], [0], [0], [1], [0, 0, 1, 1], [], []>} : vector<16x36xbf16>, vector<36x256xbf16>, vector<16x256xf32> -> vector<16x256xf32>
    %c0_5 = arith.constant 0 : index
    %c0_6 = arith.constant 0 : index
    %18 = vector.load %arg2[%c0_5, %c0_6] : memref<16x1xf32, #tpu.memory_space<vmem>>, vector<16x1xf32>
    %19 = vector.broadcast %18 : vector<16x1xf32> to vector<16x256xf32>
    %20 = arith.addf %17, %19 : vector<16x256xf32>
    %cst_7 = arith.constant 0.000000e+00 : f32
    %21 = vector.broadcast %cst_7 : f32 to vector<16x256xf32>
    %22 = arith.maximumf %20, %21 : vector<16x256xf32>
    %23 = vector.extract_strided_slice %22 {offsets = [0, 0], sizes = [1, 256], strides = [1, 1]} : vector<16x256xf32> to vector<1x256xf32>
    %c0_8 = arith.constant 0 : index
    %c0_9 = arith.constant 0 : index
    %24 = vector.load %arg8[%c0_8, %c0_9] : memref<1x4096xf32, #tpu.memory_space<vmem>>, vector<1x256xf32>
    tpu.vector_store %arg8[%c0_8, %c0_9], %23 {strides = array<i32>} : memref<1x4096xf32, #tpu.memory_space<vmem>>, vector<1x256xf32>,
    %25 = vector.extract_strided_slice %22 {offsets = [1, 0], sizes = [1, 256], strides = [1, 1]} : vector<16x256xf32> to vector<1x256xf32>
    %c0_10 = arith.constant 0 : index
    %c256 = arith.constant 256 : index
    %26 = vector.load %arg8[%c0_10, %c256] : memref<1x4096xf32, #tpu.memory_space<vmem>>, vector<1x256xf32>
    tpu.vector_store %arg8[%c0_10, %c256], %25 {strides = array<i32>} : memref<1x4096xf32, #tpu.memory_space<vmem>>, vector<1x256xf32>,
    %27 = vector.extract_strided_slice %22 {offsets = [2, 0], sizes = [1, 256], strides = [1, 1]} : vector<16x256xf32> to vector<1x256xf32>
    %c0_11 = arith.constant 0 : index
    %c512 = arith.constant 512 : index
    %28 = vector.load %arg8[%c0_11, %c512] : memref<1x4096xf32, #tpu.memory_space<vmem>>, vector<1x256xf32>
    tpu.vector_store %arg8[%c0_11, %c512], %27 {strides = array<i32>} : memref<1x4096xf32, #tpu.memory_space<vmem>>, vector<1x256xf32>,
    %29 = vector.extract_strided_slice %22 {offsets = [3, 0], sizes = [1, 256], strides = [1, 1]} : vector<16x256xf32> to vector<1x256xf32>
    %c0_12 = arith.constant 0 : index
    %c768 = arith.constant 768 : index
    %30 = vector.load %arg8[%c0_12, %c768] : memref<1x4096xf32, #tpu.memory_space<vmem>>, vector<1x256xf32>
    tpu.vector_store %arg8[%c0_12, %c768], %29 {strides = array<i32>} : memref<1x4096xf32, #tpu.memory_space<vmem>>, vector<1x256xf32>,
    %31 = vector.extract_strided_slice %22 {offsets = [4, 0], sizes = [1, 256], strides = [1, 1]} : vector<16x256xf32> to vector<1x256xf32>
    %c0_13 = arith.constant 0 : index
    %c1024 = arith.constant 1024 : index
    %32 = vector.load %arg8[%c0_13, %c1024] : memref<1x4096xf32, #tpu.memory_space<vmem>>, vector<1x256xf32>
    tpu.vector_store %arg8[%c0_13, %c1024], %31 {strides = array<i32>} : memref<1x4096xf32, #tpu.memory_space<vmem>>, vector<1x256xf32>,
    %33 = vector.extract_strided_slice %22 {offsets = [5, 0], sizes = [1, 256], strides = [1, 1]} : vector<16x256xf32> to vector<1x256xf32>
    %c0_14 = arith.constant 0 : index
    %c1280 = arith.constant 1280 : index
    %34 = vector.load %arg8[%c0_14, %c1280] : memref<1x4096xf32, #tpu.memory_space<vmem>>, vector<1x256xf32>
    tpu.vector_store %arg8[%c0_14, %c1280], %33 {strides = array<i32>} : memref<1x4096xf32, #tpu.memory_space<vmem>>, vector<1x256xf32>,
    %35 = vector.extract_strided_slice %22 {offsets = [6, 0], sizes = [1, 256], strides = [1, 1]} : vector<16x256xf32> to vector<1x256xf32>
    %c0_15 = arith.constant 0 : index
    %c1536 = arith.constant 1536 : index
    %36 = vector.load %arg8[%c0_15, %c1536] : memref<1x4096xf32, #tpu.memory_space<vmem>>, vector<1x256xf32>
    tpu.vector_store %arg8[%c0_15, %c1536], %35 {strides = array<i32>} : memref<1x4096xf32, #tpu.memory_space<vmem>>, vector<1x256xf32>,
    %37 = vector.extract_strided_slice %22 {offsets = [7, 0], sizes = [1, 256], strides = [1, 1]} : vector<16x256xf32> to vector<1x256xf32>
    %c0_16 = arith.constant 0 : index
    %c1792 = arith.constant 1792 : index
    %38 = vector.load %arg8[%c0_16, %c1792] : memref<1x4096xf32, #tpu.memory_space<vmem>>, vector<1x256xf32>
    tpu.vector_store %arg8[%c0_16, %c1792], %37 {strides = array<i32>} : memref<1x4096xf32, #tpu.memory_space<vmem>>, vector<1x256xf32>,
    %39 = vector.extract_strided_slice %22 {offsets = [8, 0], sizes = [1, 256], strides = [1, 1]} : vector<16x256xf32> to vector<1x256xf32>
    %c0_17 = arith.constant 0 : index
    %c2048 = arith.constant 2048 : index
    %40 = vector.load %arg8[%c0_17, %c2048] : memref<1x4096xf32, #tpu.memory_space<vmem>>, vector<1x256xf32>
    tpu.vector_store %arg8[%c0_17, %c2048], %39 {strides = array<i32>} : memref<1x4096xf32, #tpu.memory_space<vmem>>, vector<1x256xf32>,
    %41 = vector.extract_strided_slice %22 {offsets = [9, 0], sizes = [1, 256], strides = [1, 1]} : vector<16x256xf32> to vector<1x256xf32>
    %c0_18 = arith.constant 0 : index
    %c2304 = arith.constant 2304 : index
    %42 = vector.load %arg8[%c0_18, %c2304] : memref<1x4096xf32, #tpu.memory_space<vmem>>, vector<1x256xf32>
    tpu.vector_store %arg8[%c0_18, %c2304], %41 {strides = array<i32>} : memref<1x4096xf32, #tpu.memory_space<vmem>>, vector<1x256xf32>,
    %43 = vector.extract_strided_slice %22 {offsets = [10, 0], sizes = [1, 256], strides = [1, 1]} : vector<16x256xf32> to vector<1x256xf32>
    %c0_19 = arith.constant 0 : index
    %c2560 = arith.constant 2560 : index
    %44 = vector.load %arg8[%c0_19, %c2560] : memref<1x4096xf32, #tpu.memory_space<vmem>>, vector<1x256xf32>
    tpu.vector_store %arg8[%c0_19, %c2560], %43 {strides = array<i32>} : memref<1x4096xf32, #tpu.memory_space<vmem>>, vector<1x256xf32>,
    %45 = vector.extract_strided_slice %22 {offsets = [11, 0], sizes = [1, 256], strides = [1, 1]} : vector<16x256xf32> to vector<1x256xf32>
    %c0_20 = arith.constant 0 : index
    %c2816 = arith.constant 2816 : index
    %46 = vector.load %arg8[%c0_20, %c2816] : memref<1x4096xf32, #tpu.memory_space<vmem>>, vector<1x256xf32>
    tpu.vector_store %arg8[%c0_20, %c2816], %45 {strides = array<i32>} : memref<1x4096xf32, #tpu.memory_space<vmem>>, vector<1x256xf32>,
    %47 = vector.extract_strided_slice %22 {offsets = [12, 0], sizes = [1, 256], strides = [1, 1]} : vector<16x256xf32> to vector<1x256xf32>
    %c0_21 = arith.constant 0 : index
    %c3072 = arith.constant 3072 : index
    %48 = vector.load %arg8[%c0_21, %c3072] : memref<1x4096xf32, #tpu.memory_space<vmem>>, vector<1x256xf32>
    tpu.vector_store %arg8[%c0_21, %c3072], %47 {strides = array<i32>} : memref<1x4096xf32, #tpu.memory_space<vmem>>, vector<1x256xf32>,
    %49 = vector.extract_strided_slice %22 {offsets = [13, 0], sizes = [1, 256], strides = [1, 1]} : vector<16x256xf32> to vector<1x256xf32>
    %c0_22 = arith.constant 0 : index
    %c3328 = arith.constant 3328 : index
    %50 = vector.load %arg8[%c0_22, %c3328] : memref<1x4096xf32, #tpu.memory_space<vmem>>, vector<1x256xf32>
    tpu.vector_store %arg8[%c0_22, %c3328], %49 {strides = array<i32>} : memref<1x4096xf32, #tpu.memory_space<vmem>>, vector<1x256xf32>,
    %51 = vector.extract_strided_slice %22 {offsets = [14, 0], sizes = [1, 256], strides = [1, 1]} : vector<16x256xf32> to vector<1x256xf32>
    %c0_23 = arith.constant 0 : index
    %c3584 = arith.constant 3584 : index
    %52 = vector.load %arg8[%c0_23, %c3584] : memref<1x4096xf32, #tpu.memory_space<vmem>>, vector<1x256xf32>
    tpu.vector_store %arg8[%c0_23, %c3584], %51 {strides = array<i32>} : memref<1x4096xf32, #tpu.memory_space<vmem>>, vector<1x256xf32>,
    %53 = vector.extract_strided_slice %22 {offsets = [15, 0], sizes = [1, 256], strides = [1, 1]} : vector<16x256xf32> to vector<1x256xf32>
    %c0_24 = arith.constant 0 : index
    %c3840 = arith.constant 3840 : index
    %54 = vector.load %arg8[%c0_24, %c3840] : memref<1x4096xf32, #tpu.memory_space<vmem>>, vector<1x256xf32>
    tpu.vector_store %arg8[%c0_24, %c3840], %53 {strides = array<i32>} : memref<1x4096xf32, #tpu.memory_space<vmem>>, vector<1x256xf32>,
    %c0_25 = arith.constant 0 : index
    %c0_26 = arith.constant 0 : index
    %55 = vector.load %arg8[%c0_25, %c0_26] : memref<1x4096xf32, #tpu.memory_space<vmem>>, vector<1x4096xf32>
    %56 = arith.truncf %55 : vector<1x4096xf32> to vector<1x4096xbf16>
    %c0_27 = arith.constant 0 : index
    %c0_28 = arith.constant 0 : index
    %57 = vector.load %arg3[%c0_27, %c0_28] : memref<4096x32xbf16, #tpu.memory_space<vmem>>, vector<4096x32xbf16>
    %cst_29 = arith.constant dense<0.000000e+00> : vector<1x32xf32>
    %58 = tpu.matmul %56, %57, %cst_29 {dimension_numbers = #tpu.dot_dimension_numbers<[1], [0], [0], [1], [0, 0, 1, 1], [], []>} : vector<1x4096xbf16>, vector<4096x32xbf16>, vector<1x32xf32> -> vector<1x32xf32>
    %c0_30 = arith.constant 0 : index
    %c0_31 = arith.constant 0 : index
    %59 = vector.load %arg4[%c0_30, %c0_31] : memref<1x32xf32, #tpu.memory_space<vmem>>, vector<1x32xf32>
    %60 = arith.addf %58, %59 : vector<1x32xf32>
    %cst_32 = arith.constant 0.000000e+00 : f32
    %61 = vector.broadcast %cst_32 : f32 to vector<1x32xf32>
    %62 = arith.maximumf %60, %61 : vector<1x32xf32>
    %63 = arith.truncf %62 : vector<1x32xf32> to vector<1x32xbf16>
    %c0_33 = arith.constant 0 : index
    %c0_34 = arith.constant 0 : index
    %64 = vector.load %arg5[%c0_33, %c0_34] : memref<32x32xbf16, #tpu.memory_space<vmem>>, vector<32x32xbf16>
    %cst_35 = arith.constant dense<0.000000e+00> : vector<1x32xf32>
    %65 = tpu.matmul %63, %64, %cst_35 {dimension_numbers = #tpu.dot_dimension_numbers<[1], [0], [0], [1], [0, 0, 1, 1], [], []>} : vector<1x32xbf16>, vector<32x32xbf16>, vector<1x32xf32> -> vector<1x32xf32>
    %c0_36 = arith.constant 0 : index
    %c0_37 = arith.constant 0 : index
    %66 = vector.load %arg6[%c0_36, %c0_37] : memref<1x32xf32, #tpu.memory_space<vmem>>, vector<1x32xf32>
    %67 = arith.addf %65, %66 : vector<1x32xf32>
    %cst_38 = arith.constant 0.000000e+00 : f32
    %68 = vector.broadcast %cst_38 : f32 to vector<1x32xf32>
    %69 = arith.maximumf %67, %68 : vector<1x32xf32>
    %c0_39 = arith.constant 0 : index
    %c0_40 = arith.constant 0 : index
    %70 = vector.load %arg7[%c0_39, %c0_40] : memref<1x32xf32, #tpu.memory_space<vmem>>, vector<1x32xf32>
    tpu.vector_store %arg7[%c0_39, %c0_40], %69 {strides = array<i32>} : memref<1x32xf32, #tpu.memory_space<vmem>>, vector<1x32xf32>,
    return
  }
}

</mosaic_0001>

<bundles_post_ra>
// kernel: cnn_layer_forward.1
= control target key start
LH: loop header
LB: loop body
LE: loop exit
PB: predicated region body
PF: predicated region fallthrough
CT: control target
= control target key end

     0   :  { %s4292_s28 = smov 112   ;;  %s4293_s29 = smov 127   ;;  %v4299_v11 = vmov 0   ;;  %vm46_vm0 = vcmask 1039360   ;;  %vm68_vm1 = vcmask 916480   ;;  %vm57_vm2 = vcmask 1031168   ;;  %s5335_s0 = inlined_call_operand.vmem [shape: f32[4,290], index: 0, kind: input, shape index: {}]   ;;  %s5336_s1 = inlined_call_operand.vmem [shape: bf16[16,36], index: 1, kind: input, shape index: {}]   ;;  %s5337_s2 = inlined_call_operand.vmem [shape: f32[16,1], index: 2, kind: input, shape index: {}]   ;;  %s5338_s3 = inlined_call_operand.vmem [shape: bf16[4096,32], index: 3, kind: input, shape index: {}]   ;;  %s5339_s4 = inlined_call_operand.vmem [shape: f32[1,32], index: 4, kind: input, shape index: {}]   ;;  %s5340_s5 = inlined_call_operand.vmem [shape: bf16[32,32], index: 5, kind: input, shape index: {}]   ;;  %s5341_s6 = inlined_call_operand.vmem [shape: f32[1,32], index: 6, kind: input, shape index: {}]   ;;  %s5342_s7 = inlined_call_operand.hbm [shape: f32[1,32], index: 7, kind: output, shape index: {}]  }
   0x1   :  { %v28_v0 = vld [vmem:[%s5335_s0] sm:$0xff]  ;;  %v29_v1 = vld [vmem:[%s5335_s0 + $0x8] sm:$0xf]  ;;  %s4294_s0 = smov 126   ;;  %s4295_s30 = smov 110   ;;  %205 = vmatprep.mubr.bf16.mxu0 %v4299_v11  ;;  %4007 = vset.pattern.permute.xlu0 %v4299_v11  ;;  %vm128_vm3 = vcmask 1043456  }
   0x2   :  { %v30_v2 = vmul.f32 0.003921569, %v28_v0  ;;  %v31_v3 = vmul.f32 0.003921569, %v29_v1  ;;  %s4296_s8 = smov 111   ;;  %s4297_s9 = smov 95   ;;  %4008 = vset.pattern.permute.xlu1 %v4299_v11 }
   0x3   :  { %s4298_s10 = smov 96   ;;  %v4010_v13 = vld [vmem:[%s5338_s3 + $0x40] sm:$0xff]   ;;  %v4014_v15 = vld [vmem:[%s5338_s3 + $0x48] sm:$0xff]   ;;  %s4300_s21 = smov 94   ;;  %vm90_vm4 = vcmask 900096   ;;  %vm79_vm5 = vcmask 908288  }
   0x4   :  { %v4351_v4 = vadd.f32 1e-06, %v30_v2  ;;  %v33_v5 = vadd.f32 1e-06, %v31_v3  ;;  %v4012_v14 = vld [vmem:[%s5338_s3] sm:$0xff]   ;;  %v146_v17 = vld [vmem:[%s5337_s2 + $0x8] sm:$0xff]  ;;  %3591 = vmatprep.subr.bf16.mxu1 %v4010_v13 }
   0x5   :  { %v145_v16 = vld [vmem:[%s5337_s2] sm:$0xff]  ;;  %3592 = vmatpush3.bf16.msra.mxu1 %v4012_v14  ;;  %vm112_vm6 = vcmask 777216   ;;  %vm101_vm7 = vcmask 785408   ;;  %vm123_vm8 = vcmask 769024   ;;  %vm166_vm9 = vcmask 1041408  }
   0x6   :  { %v39_v6 = vcombine.low %v33_v5, %v33_v5  ;;  %v4355_v7 = vcombine.high %v4351_v4, %v4351_v4  ;;  %v38_v9 = vcombine.low %v4351_v4, %v4351_v4  ;;  %3593 = vmatprep.subr.bf16.mxu1 %v4014_v15  ;;  %vm162_vm10 = vcmask 293888  }
   0x8   :  { %v3977_v8 = vpack.i.bf16 %v39_v6, %v4351_v4  ;;  %v3972_v10 = vpack.i.bf16 %v33_v5, %v4355_v7  ;;  %v4002_v12 = vpack.i.bf16 %v4355_v7, %v4351_v4 }
   0xa   :  { %3978 = vrot.lane.b32.xlu1 %v3977_v8, %s4292_s28  ;;  %3968 = vrot.lane.b32.xlu0 %v3977_v8, %s4293_s29 }
   0xe   :  { %40 = vrot.lane.b32.xlu1 %v38_v9, %s4293_s29  ;;  %3973 = vrot.lane.b32.xlu0 %v3972_v10, %s4294_s0 }
  0x12   :  { %62 = vrot.lane.b32.xlu1 %v38_v9, %s4292_s28  ;;  %51 = vrot.lane.b32.xlu0 %v4351_v4, %s4294_s0 }
  0x16   :  { %3988 = vrot.lane.b32.xlu1 %v3977_v8, %s4295_s30  ;;  %3983 = vrot.lane.b32.xlu0 %v3972_v10, %s4296_s8 }
  0x1a   :  { %3998 = vrot.lane.b32.xlu1 %v3977_v8, %s4297_s9  ;;  %3993 = vrot.lane.b32.xlu0 %v3972_v10, %s4298_s10 }
  0x1e   :  { %84 = vrot.lane.b32.xlu1 %v38_v9, %s4295_s30  ;;  %73 = vrot.lane.b32.xlu0 %v4351_v4, %s4296_s8 }
  0x22   :  { %106 = vrot.lane.b32.xlu1 %v38_v9, %s4297_s9  ;;  %95 = vrot.lane.b32.xlu0 %v4351_v4, %s4298_s10 }
  0x26   :  { %4003 = vrot.lane.b32.xlu0 %v4002_v12, %s4300_s21  ;;  %121 = vrot.lane.b32.xlu1 %v33_v5, %s4300_s21  ;;  %v4011_v12 = vld [vmem:[%s5338_s3 + $0xc0] sm:$0xff]  }
  0x2a   :  { %149 = vperm.xlu0 %4007, %v145_v16   ;;  %154 = vperm.xlu1 %4008, %v146_v17   ;;  %v4009_v17 = vld [vmem:[%s5336_s1] sm:$0xff]  }
  0x7c   :  { %v3979_v18 = vpop.permute.xlu1 %3978  ;;  %v3969_v19 = vpop.permute.xlu0 %3968 }
  0x7d   :  { %v3971_v20 = vunpack.i.h.bf16 %v3969_v19  ;;  %v3970_v21 = vunpack.i.l.bf16 %v3969_v19  ;;  %v3981_v22 = vunpack.i.h.bf16 %v3979_v18  ;;  %v3980_v23 = vunpack.i.l.bf16 %v3979_v18  ;;  %v4013_v19 = vld [vmem:[%s5338_s3 + $0x80] sm:$0xff]  }
  0x7f   :  { %v48_v28 = vsel %vm46_vm0, %v3970_v21, %v3971_v20  ;;  %v70_v31 = vsel %vm68_vm1, %v3980_v23, %v3981_v22 }
  0x80   :  { %v41_v24 = vpop.permute.xlu1 %40  ;;  %v3974_v25 = vpop.permute.xlu0 %3973  ;;  %v130_v34 = vsel %vm128_vm3, %v4355_v7, %v48_v28 }
  0x81   :  { %v3976_v26 = vunpack.i.h.bf16 %v3974_v25  ;;  %v3975_v27 = vunpack.i.l.bf16 %v3974_v25  ;;  %v47_v29 = vsel %vm46_vm0, %v41_v24, %v3970_v21 }
  0x82   :  { %v129_v39 = vsel %vm128_vm3, %v4351_v4, %v47_v29 }
  0x83   :  { %v59_v30 = vsel %vm57_vm2, %v3975_v27, %v3976_v26 }
  0x84   :  { %v63_v32 = vpop.permute.xlu1 %62  ;;  %v52_v33 = vpop.permute.xlu0 %51  ;;  %v132_v35 = vsel %vm128_vm3, %v59_v30, %v70_v31 }
  0x85   :  { %v69_v36 = vsel %vm68_vm1, %v63_v32, %v3980_v23  ;;  %v58_v37 = vsel %vm57_vm2, %v52_v33, %v3975_v27  ;;  %v138_v38 = vpack.c.bf16 %v132_v35, %v130_v34 }
  0x86   :  { %v131_v40 = vsel %vm128_vm3, %v58_v37, %v69_v36 }
  0x87   :  { %173 = vmatprep.subr.bf16.mxu0 %v138_v38  ;;  %v137_v41 = vpack.c.bf16 %v131_v40, %v129_v39 }
  0x88   :  { %v3989_v42 = vpop.permute.xlu1 %3988  ;;  %v3984_v43 = vpop.permute.xlu0 %3983 }
  0x89   :  { %v3991_v44 = vunpack.i.h.bf16 %v3989_v42  ;;  %v3990_v45 = vunpack.i.l.bf16 %v3989_v42  ;;  %v3986_v46 = vunpack.i.h.bf16 %v3984_v43  ;;  %v3985_v47 = vunpack.i.l.bf16 %v3984_v43  ;;  %174 = vmatpush1.bf16.msra.mxu0 %v137_v41 }
  0x8b   :  { %v92_v50 = vsel %vm90_vm4, %v3990_v45, %v3991_v44  ;;  %v81_v51 = vsel %vm79_vm5, %v3985_v47, %v3986_v46 }
  0x8c   :  { %v3999_v48 = vpop.permute.xlu1 %3998  ;;  %v3994_v49 = vpop.permute.xlu0 %3993  ;;  %v134_v60 = vsel %vm128_vm3, %v81_v51, %v92_v50 }
  0x8d   :  { %v4001_v52 = vunpack.i.h.bf16 %v3999_v48  ;;  %v4000_v53 = vunpack.i.l.bf16 %v3999_v48  ;;  %v3996_v54 = vunpack.i.h.bf16 %v3994_v49  ;;  %v3995_v55 = vunpack.i.l.bf16 %v3994_v49 }
  0x8f   :  { %v114_v56 = vsel %vm112_vm6, %v4000_v53, %v4001_v52  ;;  %v103_v57 = vsel %vm101_vm7, %v3995_v55, %v3996_v54 }
  0x90   :  { %v85_v58 = vpop.permute.xlu1 %84  ;;  %v74_v59 = vpop.permute.xlu0 %73  ;;  %v136_v61 = vsel %vm128_vm3, %v103_v57, %v114_v56 }
  0x91   :  { %v140_v62 = vpack.c.bf16 %v136_v61, %v134_v60  ;;  %v91_v63 = vsel %vm90_vm4, %v85_v58, %v3990_v45  ;;  %v80_v0 = vsel %vm79_vm5, %v74_v59, %v3985_v47 }
  0x92   :  { %v133_v5 = vsel %vm128_vm3, %v80_v0, %v91_v63 }
  0x93   :  { %175 = vmatprep.subr.bf16.mxu0 %v140_v62 }
  0x94   :  { %v107_v1 = vpop.permute.xlu1 %106  ;;  %v96_v2 = vpop.permute.xlu0 %95 }
  0x95   :  { %v113_v3 = vsel %vm112_vm6, %v107_v1, %v4000_v53  ;;  %v102_v4 = vsel %vm101_vm7, %v96_v2, %v3995_v55 }
  0x96   :  { %v135_v6 = vsel %vm128_vm3, %v102_v4, %v113_v3 }
  0x97   :  { %v139_v7 = vpack.c.bf16 %v135_v6, %v133_v5 }
  0x98   :  { %v4004_v8 = vpop.permute.xlu0 %4003  ;;  %v122_v9 = vpop.permute.xlu1 %121 }
  0x99   :  { %v4006_v10 = vunpack.i.h.bf16 %v4004_v8  ;;  %v4005_v11 = vunpack.i.l.bf16 %v4004_v8  ;;  %176 = vmatpush1.bf16.msra.mxu0 %v139_v7 }
  0x9b   :  { %v125_v13 = vsel %vm123_vm8, %v4006_v10, %v122_v9  ;;  %v124_v14 = vsel %vm123_vm8, %v4005_v11, %v4006_v10 }
  0x9c   :  { %v142_v15 = vpack.c.bf16 %v125_v13, %v125_v13  ;;  %v141_v16 = vpack.c.bf16 %v124_v14, %v124_v14 }
  0x9e   :  { %3330 = vmatprep.subr.msk.bf16.mxu0 %vm166_vm9, %v142_v15  ;;  %v168_v18 = vsel %vm166_vm9, %v141_v16, 0 }
  0x9f   :  { %178 = vmatpush1.bf16.msra.mxu0 %v168_v18 }
  0xa0   :  { %3613 = vmatprep.subr.bf16.mxu0 %v4011_v12 }
  0xa2   :  { %3331 = vmatmul.mubr.msk.bf16.vlgmr.msra.gmra.mrb[0].mxu0 %vm162_vm10, %v4009_v17 }
  0xa3   :  { %3614 = vmatpush3.bf16.msra.mxu0 %v4013_v19 }
  0xa4   :  { %12 = vsyncpa [#allocation4], 0  ;;  %v4015_v20 = vld [vmem:[%s5338_s3 + $0xc8] sm:$0xff]   ;;  %v4018_v23 = vld [vmem:[%s5338_s3 + $0x50] sm:$0xff]   ;;  %v4301_v49 = vmov 1966171168   ;;  %v226_v51 = vlaneseq }
  0xa5   :  { %v4016_v21 = vld [vmem:[%s5338_s3 + $0x8] sm:$0xff]   ;;  %3615 = vmatprep.subr.bf16.mxu0 %v4015_v20  ;;  %v4019_v24 = vld [vmem:[%s5338_s3 + $0xd0] sm:$0xff]   ;;  %v4022_v27 = vld [vmem:[%s5338_s3 + $0x58] sm:$0xff]   ;;  %v224_v50 = vunpack.c.l.s4 %v4301_v49  ;;  %vm4303_vm12 = vmmov 0   ;;  %vm3268_vm13 = vcmask 261120   ;;  %s4304_s15 = smov [#allocation3]  }
  0xa6   :  { %v4017_v22 = vld [vmem:[%s5338_s3 + $0x88] sm:$0xff]   ;;  %3594 = vmatpush3.bf16.msra.mxu1 %v4016_v21  ;;  %v4020_v25 = vld [vmem:[%s5338_s3 + $0x10] sm:$0xff]   ;;  %v4023_v28 = vld [vmem:[%s5338_s3 + $0xd8] sm:$0xff]   ;;  %v4506_v55 = vshrl.u32 %v226_v51, 7  ;;  %vm4509_vm11 = vcmp.lt.s32.totalorder %v226_v51, 256  ;;  %s3321_s16 = sshll.u32 %s4304_s15, 4  ;;  %s3322_s16 = int_to_ptr.vmem [resolvable:$true] %s3321_s16 }
  0xa7   :  { %3616 = vmatpush3.bf16.msra.mxu0 %v4017_v22  ;;  %v4021_v26 = vld [vmem:[%s5338_s3 + $0x90] sm:$0xff]   ;;  %3595 = vmatprep.subr.bf16.mxu1 %v4018_v23  ;;  %v4024_v29 = vld [vmem:[%s5338_s3 + $0x18] sm:$0xff]   ;;  %v4026_v31 = vld [vmem:[%s5338_s3 + $0x60] sm:$0xff]   ;;  %v225_v54 = vunpack.c.0.s8 %v224_v50  ;;  %vm3313_vm14 = vcmask 253952   ;;  %s4268_s17 = scalar_lea.vmem %s3322_s16, 16  ;;  %s4272_s18 = scalar_lea.vmem %s3322_s16, 32 }
  0xa8   :  { %3617 = vmatprep.subr.bf16.mxu0 %v4019_v24  ;;  %v4025_v30 = vld [vmem:[%s5338_s3 + $0x98] sm:$0xff]   ;;  %v4027_v32 = vld [vmem:[%s5338_s3 + $0xe0] sm:$0xff]   ;;  %v4030_v35 = vld [vmem:[%s5338_s3 + $0x68] sm:$0xff]   ;;  %p4269_p0 = scmp.ne.s32.totalorder %s3322_s16, %s4268_s17  ;;  %p4273_p1 = scmp.lt.s32.totalorder %s3322_s16, %s3322_s16 }
  0xa9   :  { %v4028_v33 = vld [vmem:[%s5338_s3 + $0x20] sm:$0xff]   ;;  %v4031_v36 = vld [vmem:[%s5338_s3 + $0xe8] sm:$0xff]   ;;  %v4034_v39 = vld [vmem:[%s5338_s3 + $0x70] sm:$0xff]   ;;  %v150_v52 = vpop.permute.xlu0 %149  ;;  %v155_v56 = vpop.permute.xlu1 %154  ;;  %v228_v1 = vsub.s32 %v225_v54, %v4506_v55  ;;  %p4274_p2 = scmp.lt.s32.totalorder %s4272_s18, %s4268_s17 }
  0xaa   :  { %3596 = vmatpush3.bf16.msra.mxu1 %v4020_v25  ;;  %v4029_v34 = vld [vmem:[%s5338_s3 + $0xa0] sm:$0xff]   ;;  %v4032_v37 = vld [vmem:[%s5338_s3 + $0x28] sm:$0xff]   ;;  %v4035_v40 = vld [vmem:[%s5338_s3 + $0xf0] sm:$0xff]  }
  0xab   :  { %3618 = vmatpush3.bf16.msra.mxu0 %v4021_v26  ;;  %3597 = vmatprep.subr.bf16.mxu1 %v4022_v27  ;;  %v4033_v38 = vld [vmem:[%s5338_s3 + $0xa8] sm:$0xff]   ;;  %v4036_v41 = vld [vmem:[%s5338_s3 + $0x30] sm:$0xff]   ;;  %v4038_v43 = vld [vmem:[%s5338_s3 + $0x78] sm:$0xff]   ;;  %p4275_p3 = por %p4274_p2, %p4273_p1 }
  0xac   :  { %3619 = vmatprep.subr.bf16.mxu0 %v4023_v28  ;;  %v4037_v42 = vld [vmem:[%s5338_s3 + $0xb0] sm:$0xff]   ;;  %v4039_v44 = vld [vmem:[%s5338_s3 + $0xf8] sm:$0xff]   ;;  %v4042_v47 = vld [vmem:[%s5338_s3 + $0x140] sm:$0xff]  }
  0xad   :  { %v4040_v45 = vld [vmem:[%s5338_s3 + $0x38] sm:$0xff]   ;;  %v4043_v48 = vld [vmem:[%s5338_s3 + $0x1c0] sm:$0xff]   ;;  %v4047_v54 = vld [vmem:[%s5338_s3 + $0x1c8] sm:$0xff]   ;;  %p4276_p4 = pnand %p4275_p3, %p4269_p0 }
  0xae   :  { %3598 = vmatpush3.bf16.msra.mxu1 %v4024_v29  ;;  %v4041_v46 = vld [vmem:[%s5338_s3 + $0xb8] sm:$0xff]   ;;  %v4044_v51 = vld [vmem:[%s5338_s3 + $0x100] sm:$0xff]   ;;  %v4062_v11 = vld [vmem:[%s5338_s3 + $0x168] sm:$0xff]  }
  0xaf   :  { %3620 = vmatpush3.bf16.msra.mxu0 %v4025_v30  ;;  %3599 = vmatprep.subr.bf16.mxu1 %v4026_v31 }
  0xb0   :  { %3621 = vmatprep.subr.bf16.mxu0 %v4027_v32 }
  0xb2   :  { %3600 = vmatpush3.bf16.msra.mxu1 %v4028_v33 }
  0xb3   :  { %3622 = vmatpush3.bf16.msra.mxu0 %v4029_v34  ;;  %3601 = vmatprep.subr.bf16.mxu1 %v4030_v35  ;;  %v4546_v34 = vsub.s32 1, %v4506_v55  ;;  %v4549_v35 = vsub.s32 3, %v4506_v55 }
  0xb4   :  { %3623 = vmatprep.subr.bf16.mxu0 %v4031_v36  ;;  %v4552_v36 = vsub.s32 0, %v4506_v55 }
  0xb6   :  { %3602 = vmatpush3.bf16.msra.mxu1 %v4032_v37  ;;  %v4555_v37 = vsub.s32 2, %v4506_v55 }
  0xb7   :  { %3624 = vmatpush3.bf16.msra.mxu0 %v4033_v38  ;;  %3603 = vmatprep.subr.bf16.mxu1 %v4034_v39  ;;  %v4558_v38 = vsub.s32 5, %v4506_v55  ;;  %v4561_v39 = vsub.s32 7, %v4506_v55 }
  0xb8   :  { %3625 = vmatprep.subr.bf16.mxu0 %v4035_v40 }
  0xba   :  { %3604 = vmatpush3.bf16.msra.mxu1 %v4036_v41 }
  0xbb   :  { %3626 = vmatpush3.bf16.msra.mxu0 %v4037_v42  ;;  %3605 = vmatprep.subr.bf16.mxu1 %v4038_v43 }
  0xbc   :  { %3627 = vmatprep.subr.bf16.mxu0 %v4039_v44 }
  0xbe   :  { %3606 = vmatpush3.bf16.msra.mxu1 %v4040_v45 }
  0xbf   :  { %3628 = vmatpush3.bf16.msra.mxu0 %v4041_v46  ;;  %3635 = vmatprep.subr.bf16.mxu1 %v4042_v47 }
  0xc0   :  { %3657 = vmatprep.subr.bf16.mxu0 %v4043_v48 }
 0x175   :  { %v207_v53 = vpop.f32.mrb[0].mxu0 }
 0x176   :  { %v208_v57 = vadd.f32 %v207_v53, %v150_v52  ;;  %v209_v58 = vpop.f32.mrb[1].mxu0  ;;  %v4046_v53 = vld [vmem:[%s5338_s3 + $0x148] sm:$0xff]  }
 0x177   :  { %v210_v59 = vadd.f32 %v209_v58, %v150_v52  ;;  %v211_v60 = vpop.f32.mrb[2].mxu0  ;;  %v4045_v52 = vld [vmem:[%s5338_s3 + $0x180] sm:$0xff]  }
 0x178   :  { %v216_v61 = vmax.f32 %v208_v57, 0.0  ;;  %v212_v62 = vadd.f32 %v211_v60, %v155_v56  ;;  %v213_v63 = vpop.f32.mrb[3].mxu0  ;;  %v4048_v60 = vld [vmem:[%s5338_s3 + $0x108] sm:$0xff]  }
 0x179   :  { %v217_v0 = vmax.f32 %v210_v59, 0.0  ;;  %v214_v2 = vadd.f32 %v213_v63, %v155_v56  ;;  %v4590_v56 = vsub.s32 6, %v4506_v55  ;;  %v4051_v63 = vld [vmem:[%s5338_s3 + $0x1d0] sm:$0xff]  }
 0x17a   :  { %v218_v3 = vmax.f32 %v212_v62, 0.0  ;;  %v4050_v62 = vld [vmem:[%s5338_s3 + $0x150] sm:$0xff]  }
 0x17b   :  { %v222_v4 = vcombine.low %v216_v61, %v217_v0  ;;  %v259_v5 = vcombine.high %v216_v61, %v217_v0  ;;  %v219_v6 = vmax.f32 %v214_v2, 0.0  ;;  %v4049_v61 = vld [vmem:[%s5338_s3 + $0x188] sm:$0xff]   ;;  %v4053_v2 = vld [vmem:[%s5338_s3 + $0x190] sm:$0xff]  }
 0x17d   :  { %v229_v7 = vrot.slane %v222_v4, %v228_v1  ;;  %v266_v8 = vrot.slane %v259_v5, %v228_v1  ;;  %v294_v9 = vcombine.low %v218_v3, %v219_v6  ;;  %v327_v10 = vcombine.high %v218_v3, %v219_v6  ;;  %v4054_v3 = vld [vmem:[%s5338_s3 + $0x158] sm:$0xff]  }
 0x17e   :  { %v4055_v4 = vld [vmem:[%s5338_s3 + $0x1d8] sm:$0xff]  }
 0x17f   :  { %v236_v12 = vrot.slane %v229_v7, %v228_v1  ;;  %v243_v13 = vcombine.high %v229_v7, %v229_v7  ;;  %v273_v14 = vrot.slane %v266_v8, %v228_v1  ;;  %v276_v15 = vcombine.high %v266_v8, %v266_v8  ;;  %v4056_v5 = vld [vmem:[%s5338_s3 + $0x118] sm:$0xff]   ;;  %v4058_v7 = vld [vmem:[%s5338_s3 + $0x160] sm:$0xff]  }
 0x180   :  { %v301_v16 = vrot.slane %v294_v9, %v228_v1  ;;  %v334_v17 = vrot.slane %v327_v10, %v228_v1  ;;  %v4057_v6 = vld [vmem:[%s5338_s3 + $0x198] sm:$0xff]   ;;  %v4059_v8 = vld [vmem:[%s5338_s3 + $0x1e0] sm:$0xff]  }
 0x181   :  { %242 = vst.msk [vmem:[#allocation2] sm:$0x3] %vm4509_vm11, %v236_v12  ;;  %v250_v18 = vrot.slane %v243_v13, %v228_v1  ;;  %v253_v19 = vcombine.high %v236_v12, %v236_v12  ;;  %275 = vst.msk [vmem:[#allocation2 + $0x8] sm:$0x3] %vm4509_vm11, %v273_v14  ;;  %v283_v20 = vrot.slane %v276_v15, %v228_v1  ;;  %v4060_v9 = vld [vmem:[%s5338_s3 + $0x120] sm:$0xff]   ;;  %v4063_v12 = vld [vmem:[%s5338_s3 + $0x1e8] sm:$0xff]  }
 0x182   :  { %v286_v21 = vcombine.high %v273_v14, %v273_v14  ;;  %v308_v22 = vrot.slane %v301_v16, %v228_v1  ;;  %v311_v23 = vcombine.high %v301_v16, %v301_v16  ;;  %v341_v24 = vrot.slane %v334_v17, %v228_v1  ;;  %v4061_v10 = vld [vmem:[%s5338_s3 + $0x1a0] sm:$0xff]   ;;  %v4064_v13 = vld [vmem:[%s5338_s3 + $0x128] sm:$0xff]   ;;  %v4066_v15 = vld [vmem:[%s5338_s3 + $0x170] sm:$0xff]  }
 0x183   :  { %v344_v25 = vcombine.high %v334_v17, %v334_v17  ;;  %252 = vst.msk [vmem:[#allocation2 + $0x2] sm:$0x3] %vm4509_vm11, %v250_v18  ;;  %255 = vst.msk [vmem:[#allocation2 + $0x4] sm:$0x3] %vm4509_vm11, %v253_v19  ;;  %v256_v26 = vcombine.high %v250_v18, %v250_v18  ;;  %v289_v27 = vcombine.high %v283_v20, %v283_v20  ;;  %v4065_v14 = vld [vmem:[%s5338_s3 + $0x1a8] sm:$0xff]   ;;  %v4067_v16 = vld [vmem:[%s5338_s3 + $0x1f0] sm:$0xff]  }
 0x184   :  { %285 = vst.msk [vmem:[#allocation2 + $0xa] sm:$0x3] %vm4509_vm11, %v283_v20  ;;  %288 = vst.msk [vmem:[#allocation2 + $0xc] sm:$0x3] %vm4509_vm11, %v286_v21  ;;  %v318_v28 = vrot.slane %v311_v23, %v228_v1  ;;  %v321_v29 = vcombine.high %v308_v22, %v308_v22  ;;  %v354_v31 = vcombine.high %v341_v24, %v341_v24  ;;  %v4068_v17 = vld [vmem:[%s5338_s3 + $0x130] sm:$0xff]   ;;  %v4070_v19 = vld [vmem:[%s5338_s3 + $0x178] sm:$0xff]  }
 0x185   :  { %310 = vst.msk [vmem:[#allocation2 + $0x10] sm:$0x3] %vm4509_vm11, %v308_v22  ;;  %343 = vst.msk [vmem:[#allocation2 + $0x18] sm:$0x3] %vm4509_vm11, %v341_v24  ;;  %v351_v30 = vrot.slane %v344_v25, %v228_v1  ;;  %v4052_v1 = vld [vmem:[%s5338_s3 + $0x110] sm:$0xff]   ;;  %v4071_v20 = vld [vmem:[%s5338_s3 + $0x1f8] sm:$0xff]  }
 0x186   :  { %258 = vst.msk [vmem:[#allocation2 + $0x6] sm:$0x3] %vm4509_vm11, %v256_v26  ;;  %291 = vst.msk [vmem:[#allocation2 + $0xe] sm:$0x3] %vm4509_vm11, %v289_v27  ;;  %v324_v32 = vcombine.high %v318_v28, %v318_v28  ;;  %v4069_v18 = vld [vmem:[%s5338_s3 + $0x1b0] sm:$0xff]   ;;  %v4671_v21 = vsub.s32 4, %v4506_v55 }
 0x187   :  { %320 = vst.msk [vmem:[#allocation2 + $0x12] sm:$0x3] %vm4509_vm11, %v318_v28  ;;  %323 = vst.msk [vmem:[#allocation2 + $0x14] sm:$0x3] %vm4509_vm11, %v321_v29  ;;  %v357_v33 = vcombine.high %v351_v30, %v351_v30  ;;  %v4072_v22 = vld [vmem:[%s5338_s3 + $0x138] sm:$0xff]   ;;  %v4074_v55 = vld [vmem:[%s5338_s3 + $0x240] sm:$0xff]  }
 0x188   :  { %353 = vst.msk [vmem:[#allocation2 + $0x1a] sm:$0x3] %vm4509_vm11, %v351_v30  ;;  %356 = vst.msk [vmem:[#allocation2 + $0x1c] sm:$0x3] %vm4509_vm11, %v354_v31  ;;  %v4073_v23 = vld [vmem:[%s5338_s3 + $0x1b8] sm:$0xff]   ;;  %v4075_v26 = vld [vmem:[%s5338_s3 + $0x2c0] sm:$0xff]  }
 0x189   :  { %326 = vst.msk [vmem:[#allocation2 + $0x16] sm:$0x3] %vm4509_vm11, %v324_v32  ;;  %359 = vst.msk [vmem:[#allocation2 + $0x1e] sm:$0x3] %vm4509_vm11, %v357_v33  ;;  %v4076_v29 = vld [vmem:[%s5338_s3 + $0x200] sm:$0xff]  }
 0x18a   :  { %v4077_v32 = vld [vmem:[%s5338_s3 + $0x280] sm:$0xff]  }
 0x18d   :  { %v4563_v40 = vld [vmem:[#allocation2] sm:$0xff]  ;;  %v4592_v59 = vld [vmem:[#allocation2 + $0x8] sm:$0xff] }
 0x18e   :  { %v375_v41 = vrot.slane %v4563_v40, %v4546_v34  ;;  %v383_v42 = vrot.slane %v4563_v40, %v4549_v35  ;;  %v371_v43 = vrot.slane %v4563_v40, %v4552_v36  ;;  %v379_v44 = vrot.slane %v4563_v40, %v4555_v37 }
 0x18f   :  { %v391_v45 = vrot.slane %v4563_v40, %v4558_v38  ;;  %v399_v46 = vrot.slane %v4563_v40, %v4561_v39  ;;  %v4608_v0 = vrot.slane %v4592_v59, %v4590_v56  ;;  %v387_v24 = vrot.slane %v4563_v40, %v4671_v21 }
 0x190   :  { %v529_v47 = vpack.c.bf16 %v375_v41, %v375_v41  ;;  %v531_v48 = vpack.c.bf16 %v383_v42, %v383_v42  ;;  %v528_v49 = vpack.c.bf16 %v371_v43, %v371_v43  ;;  %v530_v50 = vpack.c.bf16 %v379_v44, %v379_v44  ;;  %v4079_v41 = vld [vmem:[%s5338_s3 + $0x2c8] sm:$0xff]  }
 0x191   :  { %v533_v57 = vpack.c.bf16 %v391_v45, %v391_v45  ;;  %v535_v58 = vpack.c.bf16 %v399_v46, %v399_v46  ;;  %v395_v25 = vrot.slane %v4563_v40, %v4590_v56  ;;  %v407_v27 = vrot.slane %v4592_v59, %v4546_v34  ;;  %v4078_v40 = vld [vmem:[%s5338_s3 + $0x248] sm:$0xff]   ;;  %v4082_v45 = vld [vmem:[%s5338_s3 + $0x250] sm:$0xff]  }
 0x192   :  { %2641 = vmatprep.mubr.bf16.mxu1 %v529_v47  ;;  %2681 = vmatprep.mubr.bf16.mxu0 %v531_v48  ;;  %v415_v28 = vrot.slane %v4592_v59, %v4549_v35  ;;  %v532_v30 = vpack.c.bf16 %v387_v24, %v387_v24  ;;  %v4080_v43 = vld [vmem:[%s5338_s3 + $0x208] sm:$0xff]   ;;  %v4083_v46 = vld [vmem:[%s5338_s3 + $0x2d0] sm:$0xff]  }
 0x193   :  { %2642 = vmatmul.mubr.bf16.vlgmr.msra.gmra.mrb[0].mxu1 %v528_v49  ;;  %2682 = vmatmul.mubr.bf16.vlgmr.msra.gmra.mrb[4].mxu0 %v530_v50  ;;  %v534_v31 = vpack.c.bf16 %v395_v25, %v395_v25  ;;  %v537_v33 = vpack.c.bf16 %v407_v27, %v407_v27  ;;  %v4081_v44 = vld [vmem:[%s5338_s3 + $0x288] sm:$0xff]   ;;  %v4084_v47 = vld [vmem:[%s5338_s3 + $0x210] sm:$0xff]   ;;  %v4086_v49 = vld [vmem:[%s5338_s3 + $0x258] sm:$0xff]  }
 0x194   :  { %3636 = vmatpush3.bf16.msra.mxu1 %v4044_v51  ;;  %3658 = vmatpush3.bf16.msra.mxu0 %v4045_v52  ;;  %v539_v42 = vpack.c.bf16 %v415_v28, %v415_v28  ;;  %v4085_v48 = vld [vmem:[%s5338_s3 + $0x290] sm:$0xff]   ;;  %v4087_v50 = vld [vmem:[%s5338_s3 + $0x2d8] sm:$0xff]   ;;  %v4112_v24 = vld [vmem:[%s5338_s3 + $0x308] sm:$0xff]  }
 0x195   :  { %2721 = vmatprep.mubr.bf16.mxu1 %v533_v57  ;;  %2761 = vmatprep.mubr.bf16.mxu0 %v535_v58  ;;  %v4088_v51 = vld [vmem:[%s5338_s3 + $0x218] sm:$0xff]   ;;  %v4092_v57 = vld [vmem:[%s5338_s3 + $0x220] sm:$0xff]   ;;  %v4113_v25 = vld [vmem:[%s5338_s3 + $0x388] sm:$0xff]  }
 0x196   :  { %3637 = vmatprep.subr.bf16.mxu1 %v4046_v53  ;;  %3659 = vmatprep.subr.bf16.mxu0 %v4047_v54  ;;  %v4089_v52 = vld [vmem:[%s5338_s3 + $0x298] sm:$0xff]   ;;  %v4090_v53 = vld [vmem:[%s5338_s3 + $0x260] sm:$0xff]   ;;  %v4116_v27 = vld [vmem:[%s5338_s3 + $0x310] sm:$0xff]  }
 0x197   :  { %v4091_v54 = vld [vmem:[%s5338_s3 + $0x2e0] sm:$0xff]   ;;  %v4117_v28 = vld [vmem:[%s5338_s3 + $0x390] sm:$0xff]  }
 0x198   :  { %3638 = vmatpush3.bf16.msra.mxu1 %v4048_v60  ;;  %3660 = vmatpush3.bf16.msra.mxu0 %v4049_v61  ;;  %v4093_v58 = vld [vmem:[%s5338_s3 + $0x2a0] sm:$0xff]   ;;  %v4094_v60 = vld [vmem:[%s5338_s3 + $0x268] sm:$0xff]  }
 0x199   :  { %3639 = vmatprep.subr.bf16.mxu1 %v4050_v62  ;;  %3661 = vmatprep.subr.bf16.mxu0 %v4051_v63  ;;  %v4095_v61 = vld [vmem:[%s5338_s3 + $0x2e8] sm:$0xff]  }
 0x19a   :  { %v4096_v62 = vld [vmem:[%s5338_s3 + $0x228] sm:$0xff]  }
 0x19b   :  { %v4097_v63 = vld [vmem:[%s5338_s3 + $0x2a8] sm:$0xff]  }
 0x19c   :  { %3640 = vmatpush3.bf16.msra.mxu1 %v4052_v1  ;;  %3662 = vmatpush3.bf16.msra.mxu0 %v4053_v2  ;;  %v4098_v1 = vld [vmem:[%s5338_s3 + $0x270] sm:$0xff]  }
 0x19d   :  { %3641 = vmatprep.subr.bf16.mxu1 %v4054_v3  ;;  %3663 = vmatprep.subr.bf16.mxu0 %v4055_v4  ;;  %v4099_v2 = vld [vmem:[%s5338_s3 + $0x2f0] sm:$0xff]  }
 0x19e   :  { %v4100_v3 = vld [vmem:[%s5338_s3 + $0x230] sm:$0xff]  }
 0x19f   :  { %v4101_v4 = vld [vmem:[%s5338_s3 + $0x2b0] sm:$0xff]  }
 0x1a0   :  { %3642 = vmatpush3.bf16.msra.mxu1 %v4056_v5  ;;  %3664 = vmatpush3.bf16.msra.mxu0 %v4057_v6  ;;  %v4102_v5 = vld [vmem:[%s5338_s3 + $0x278] sm:$0xff]  }
 0x1a1   :  { %3643 = vmatprep.subr.bf16.mxu1 %v4058_v7  ;;  %3665 = vmatprep.subr.bf16.mxu0 %v4059_v8  ;;  %v4103_v6 = vld [vmem:[%s5338_s3 + $0x2f8] sm:$0xff]  }
 0x1a2   :  { %v4104_v7 = vld [vmem:[%s5338_s3 + $0x238] sm:$0xff]  }
 0x1a3   :  { %v4105_v8 = vld [vmem:[%s5338_s3 + $0x2b8] sm:$0xff]  }
 0x1a4   :  { %3644 = vmatpush3.bf16.msra.mxu1 %v4060_v9  ;;  %3666 = vmatpush3.bf16.msra.mxu0 %v4061_v10  ;;  %v403_v9 = vrot.slane %v4592_v59, %v4552_v36  ;;  %v4106_v10 = vld [vmem:[%s5338_s3 + $0x340] sm:$0xff]  }
 0x1a5   :  { %3645 = vmatprep.subr.bf16.mxu1 %v4062_v11  ;;  %3667 = vmatprep.subr.bf16.mxu0 %v4063_v12  ;;  %v411_v11 = vrot.slane %v4592_v59, %v4555_v37  ;;  %v4107_v12 = vld [vmem:[%s5338_s3 + $0x3c0] sm:$0xff]  }
 0x1a8   :  { %3646 = vmatpush3.bf16.msra.mxu1 %v4064_v13  ;;  %3668 = vmatpush3.bf16.msra.mxu0 %v4065_v14  ;;  %v423_v13 = vrot.slane %v4592_v59, %v4558_v38  ;;  %v4108_v14 = vld [vmem:[%s5338_s3 + $0x300] sm:$0xff]  }
 0x1a9   :  { %3647 = vmatprep.subr.bf16.mxu1 %v4066_v15  ;;  %3669 = vmatprep.subr.bf16.mxu0 %v4067_v16  ;;  %v431_v15 = vrot.slane %v4592_v59, %v4561_v39  ;;  %v536_v16 = vpack.c.bf16 %v403_v9, %v403_v9  ;;  %v4146_v9 = vld [vmem:[%s5338_s3 + $0x450] sm:$0xff]  }
 0x1ac   :  { %3648 = vmatpush3.bf16.msra.mxu1 %v4068_v17  ;;  %3670 = vmatpush3.bf16.msra.mxu0 %v4069_v18  ;;  %v4109_v17 = vld [vmem:[%s5338_s3 + $0x380] sm:$0xff]   ;;  %v538_v18 = vpack.c.bf16 %v411_v11, %v411_v11  ;;  %v4148_v11 = vld [vmem:[%s5338_s3 + $0x410] sm:$0xff]  }
 0x1ad   :  { %3649 = vmatprep.subr.bf16.mxu1 %v4070_v19  ;;  %3671 = vmatprep.subr.bf16.mxu0 %v4071_v20  ;;  %v4110_v19 = vld [vmem:[%s5338_s3 + $0x348] sm:$0xff]   ;;  %v541_v20 = vpack.c.bf16 %v423_v13, %v423_v13  ;;  %v4150_v13 = vld [vmem:[%s5338_s3 + $0x458] sm:$0xff]  }
 0x1b0   :  { %3650 = vmatpush3.bf16.msra.mxu1 %v4072_v22  ;;  %3672 = vmatpush3.bf16.msra.mxu0 %v4073_v23  ;;  %v4111_v22 = vld [vmem:[%s5338_s3 + $0x3c8] sm:$0xff]   ;;  %v543_v23 = vpack.c.bf16 %v431_v15, %v431_v15  ;;  %v4152_v15 = vld [vmem:[%s5338_s3 + $0x418] sm:$0xff]  }
 0x1b1   :  { %3679 = vmatprep.subr.bf16.mxu1 %v4074_v55  ;;  %3701 = vmatprep.subr.bf16.mxu0 %v4075_v26  ;;  %v4114_v55 = vld [vmem:[%s5338_s3 + $0x350] sm:$0xff]  }
 0x1b2   :  { %v4115_v26 = vld [vmem:[%s5338_s3 + $0x3d0] sm:$0xff]  }
 0x1b3   :  { %2722 = vmatmul.mubr.bf16.vlgmr.msra.gmra.mrb[4].mxu1 %v532_v30  ;;  %2762 = vmatmul.mubr.bf16.vlgmr.msra.gmra.mrb[8].mxu0 %v534_v31  ;;  %v4119_v30 = vld [vmem:[%s5338_s3 + $0x3d8] sm:$0xff]  }
 0x1b4   :  { %3680 = vmatpush3.bf16.msra.mxu1 %v4076_v29  ;;  %2801 = vmatprep.mubr.bf16.mxu1 %v537_v33  ;;  %v4118_v29 = vld [vmem:[%s5338_s3 + $0x358] sm:$0xff]   ;;  %v4122_v33 = vld [vmem:[%s5338_s3 + $0x360] sm:$0xff]  }
 0x1b5   :  { %3702 = vmatpush3.bf16.msra.mxu0 %v4077_v32  ;;  %2841 = vmatprep.mubr.bf16.mxu0 %v539_v42  ;;  %v4120_v31 = vld [vmem:[%s5338_s3 + $0x318] sm:$0xff]   ;;  %v4125_v42 = vld [vmem:[%s5338_s3 + $0x3a0] sm:$0xff]  }
 0x1b6   :  { %3681 = vmatprep.subr.bf16.mxu1 %v4078_v40  ;;  %3703 = vmatprep.subr.bf16.mxu0 %v4079_v41  ;;  %v4121_v32 = vld [vmem:[%s5338_s3 + $0x398] sm:$0xff]   ;;  %v4123_v40 = vld [vmem:[%s5338_s3 + $0x3e0] sm:$0xff]  }
 0x1b7   :  { %v4124_v41 = vld [vmem:[%s5338_s3 + $0x320] sm:$0xff]  }
 0x1b8   :  { %3682 = vmatpush3.bf16.msra.mxu1 %v4080_v43  ;;  %v4126_v43 = vld [vmem:[%s5338_s3 + $0x368] sm:$0xff]  }
 0x1b9   :  { %3704 = vmatpush3.bf16.msra.mxu0 %v4081_v44  ;;  %3683 = vmatprep.subr.bf16.mxu1 %v4082_v45  ;;  %v4127_v44 = vld [vmem:[%s5338_s3 + $0x3e8] sm:$0xff]  }
 0x1ba   :  { %3705 = vmatprep.subr.bf16.mxu0 %v4083_v46  ;;  %v4128_v45 = vld [vmem:[%s5338_s3 + $0x328] sm:$0xff]  }
 0x1bb   :  { %v4129_v46 = vld [vmem:[%s5338_s3 + $0x3a8] sm:$0xff]  }
 0x1bc   :  { %3684 = vmatpush3.bf16.msra.mxu1 %v4084_v47  ;;  %v4130_v47 = vld [vmem:[%s5338_s3 + $0x370] sm:$0xff]  }
 0x1bd   :  { %3706 = vmatpush3.bf16.msra.mxu0 %v4085_v48  ;;  %3685 = vmatprep.subr.bf16.mxu1 %v4086_v49  ;;  %v4131_v48 = vld [vmem:[%s5338_s3 + $0x3f0] sm:$0xff]  }
 0x1be   :  { %3707 = vmatprep.subr.bf16.mxu0 %v4087_v50  ;;  %v4132_v49 = vld [vmem:[%s5338_s3 + $0x330] sm:$0xff]  }
 0x1bf   :  { %v4133_v50 = vld [vmem:[%s5338_s3 + $0x3b0] sm:$0xff]  }
 0x1c0   :  { %3686 = vmatpush3.bf16.msra.mxu1 %v4088_v51  ;;  %v4134_v51 = vld [vmem:[%s5338_s3 + $0x378] sm:$0xff]  }
 0x1c1   :  { %3708 = vmatpush3.bf16.msra.mxu0 %v4089_v52  ;;  %3687 = vmatprep.subr.bf16.mxu1 %v4090_v53  ;;  %v4135_v52 = vld [vmem:[%s5338_s3 + $0x3f8] sm:$0xff]  }
 0x1c2   :  { %3709 = vmatprep.subr.bf16.mxu0 %v4091_v54  ;;  %v4136_v53 = vld [vmem:[%s5338_s3 + $0x338] sm:$0xff]   ;;  %v4884_v54 = vld [vmem:[#allocation2 + $0x10] sm:$0xff] }
 0x1c4   :  { %3688 = vmatpush3.bf16.msra.mxu1 %v4092_v57  ;;  %v4137_v57 = vld [vmem:[%s5338_s3 + $0x3b8] sm:$0xff]  }
 0x1c5   :  { %3710 = vmatpush3.bf16.msra.mxu0 %v4093_v58  ;;  %3689 = vmatprep.subr.bf16.mxu1 %v4094_v60  ;;  %v419_v58 = vrot.slane %v4592_v59, %v4671_v21  ;;  %v4138_v60 = vld [vmem:[%s5338_s3 + $0x440] sm:$0xff]   ;;  %v447_v59 = vrot.slane %v4884_v54, %v4549_v35 }
 0x1c6   :  { %3711 = vmatprep.subr.bf16.mxu0 %v4095_v61  ;;  %v4139_v61 = vld [vmem:[%s5338_s3 + $0x4c0] sm:$0xff]  }
 0x1c8   :  { %3690 = vmatpush3.bf16.msra.mxu1 %v4096_v62  ;;  %v439_v62 = vrot.slane %v4884_v54, %v4546_v34 }
 0x1c9   :  { %3712 = vmatpush3.bf16.msra.mxu0 %v4097_v63  ;;  %3691 = vmatprep.subr.bf16.mxu1 %v4098_v1  ;;  %v4140_v63 = vld [vmem:[%s5338_s3 + $0x400] sm:$0xff]   ;;  %v540_v1 = vpack.c.bf16 %v419_v58, %v419_v58  ;;  %v4178_v58 = vld [vmem:[%s5338_s3 + $0x550] sm:$0xff]  }
 0x1ca   :  { %3713 = vmatprep.subr.bf16.mxu0 %v4099_v2  ;;  %v4141_v2 = vld [vmem:[%s5338_s3 + $0x480] sm:$0xff]  }
 0x1cc   :  { %3692 = vmatpush3.bf16.msra.mxu1 %v4100_v3  ;;  %v542_v3 = vpack.c.bf16 %v4608_v0, %v4608_v0  ;;  %v4145_v0 = vld [vmem:[%s5338_s3 + $0x488] sm:$0xff]  }
 0x1cd   :  { %3714 = vmatpush3.bf16.msra.mxu0 %v4101_v4  ;;  %3693 = vmatprep.subr.bf16.mxu1 %v4102_v5  ;;  %v4142_v4 = vld [vmem:[%s5338_s3 + $0x448] sm:$0xff]   ;;  %v545_v5 = vpack.c.bf16 %v439_v62, %v439_v62  ;;  %v4181_v62 = vld [vmem:[%s5338_s3 + $0x590] sm:$0xff]  }
 0x1ce   :  { %3715 = vmatprep.subr.bf16.mxu0 %v4103_v6  ;;  %v4143_v6 = vld [vmem:[%s5338_s3 + $0x4c8] sm:$0xff]  }
 0x1d0   :  { %3694 = vmatpush3.bf16.msra.mxu1 %v4104_v7  ;;  %v547_v7 = vpack.c.bf16 %v447_v59, %v447_v59  ;;  %v4183_v59 = vld [vmem:[%s5338_s3 + $0x5d8] sm:$0xff]  }
 0x1d1   :  { %3716 = vmatpush3.bf16.msra.mxu0 %v4105_v8  ;;  %3723 = vmatprep.subr.bf16.mxu1 %v4106_v10  ;;  %v4144_v8 = vld [vmem:[%s5338_s3 + $0x408] sm:$0xff]   ;;  %v4147_v10 = vld [vmem:[%s5338_s3 + $0x4d0] sm:$0xff]  }
 0x1d2   :  { %3745 = vmatprep.subr.bf16.mxu0 %v4107_v12  ;;  %v4149_v12 = vld [vmem:[%s5338_s3 + $0x490] sm:$0xff]  }
 0x1d3   :  { %2802 = vmatmul.mubr.bf16.vlgmr.msra.gmra.mrb[8].mxu1 %v536_v16  ;;  %v4153_v16 = vld [vmem:[%s5338_s3 + $0x498] sm:$0xff]  }
 0x1d4   :  { %2842 = vmatmul.mubr.bf16.vlgmr.msra.gmra.mrb[12].mxu0 %v538_v18  ;;  %3724 = vmatpush3.bf16.msra.mxu1 %v4108_v14  ;;  %v4151_v14 = vld [vmem:[%s5338_s3 + $0x4d8] sm:$0xff]   ;;  %v4155_v18 = vld [vmem:[%s5338_s3 + $0x4e0] sm:$0xff]  }
 0x1d5   :  { %2881 = vmatprep.mubr.bf16.mxu1 %v541_v20  ;;  %3746 = vmatpush3.bf16.msra.mxu0 %v4109_v17  ;;  %v4154_v17 = vld [vmem:[%s5338_s3 + $0x460] sm:$0xff]  }
 0x1d6   :  { %2921 = vmatprep.mubr.bf16.mxu0 %v543_v23  ;;  %3725 = vmatprep.subr.bf16.mxu1 %v4110_v19  ;;  %v4156_v19 = vld [vmem:[%s5338_s3 + $0x420] sm:$0xff]   ;;  %v4159_v23 = vld [vmem:[%s5338_s3 + $0x4e8] sm:$0xff]  }
 0x1d7   :  { %3747 = vmatprep.subr.bf16.mxu0 %v4111_v22  ;;  %v4157_v20 = vld [vmem:[%s5338_s3 + $0x4a0] sm:$0xff]   ;;  %v4158_v22 = vld [vmem:[%s5338_s3 + $0x468] sm:$0xff]  }
 0x1d8   :  { %3726 = vmatpush3.bf16.msra.mxu1 %v4112_v24  ;;  %v4160_v24 = vld [vmem:[%s5338_s3 + $0x428] sm:$0xff]  }
 0x1d9   :  { %3748 = vmatpush3.bf16.msra.mxu0 %v4113_v25  ;;  %3727 = vmatprep.subr.bf16.mxu1 %v4114_v55  ;;  %v4161_v25 = vld [vmem:[%s5338_s3 + $0x4a8] sm:$0xff]   ;;  %v4162_v55 = vld [vmem:[%s5338_s3 + $0x470] sm:$0xff]  }
 0x1da   :  { %3749 = vmatprep.subr.bf16.mxu0 %v4115_v26  ;;  %v4163_v26 = vld [vmem:[%s5338_s3 + $0x4f0] sm:$0xff]  }
 0x1dc   :  { %3728 = vmatpush3.bf16.msra.mxu1 %v4116_v27  ;;  %v4164_v27 = vld [vmem:[%s5338_s3 + $0x430] sm:$0xff]  }
 0x1dd   :  { %3750 = vmatpush3.bf16.msra.mxu0 %v4117_v28  ;;  %3729 = vmatprep.subr.bf16.mxu1 %v4118_v29  ;;  %v4165_v28 = vld [vmem:[%s5338_s3 + $0x4b0] sm:$0xff]   ;;  %v4166_v29 = vld [vmem:[%s5338_s3 + $0x478] sm:$0xff]  }
 0x1de   :  { %3751 = vmatprep.subr.bf16.mxu0 %v4119_v30  ;;  %v4167_v30 = vld [vmem:[%s5338_s3 + $0x4f8] sm:$0xff]  }
 0x1e0   :  { %3730 = vmatpush3.bf16.msra.mxu1 %v4120_v31  ;;  %v4168_v31 = vld [vmem:[%s5338_s3 + $0x438] sm:$0xff]  }
 0x1e1   :  { %3752 = vmatpush3.bf16.msra.mxu0 %v4121_v32  ;;  %3731 = vmatprep.subr.bf16.mxu1 %v4122_v33  ;;  %v4169_v32 = vld [vmem:[%s5338_s3 + $0x4b8] sm:$0xff]   ;;  %v435_v33 = vrot.slane %v4884_v54, %v4552_v36 }
 0x1e2   :  { %3753 = vmatprep.subr.bf16.mxu0 %v4123_v40  ;;  %v4170_v40 = vld [vmem:[%s5338_s3 + $0x540] sm:$0xff]  }
 0x1e4   :  { %3732 = vmatpush3.bf16.msra.mxu1 %v4124_v41  ;;  %v443_v41 = vrot.slane %v4884_v54, %v4555_v37 }
 0x1e5   :  { %3754 = vmatpush3.bf16.msra.mxu0 %v4125_v42  ;;  %3733 = vmatprep.subr.bf16.mxu1 %v4126_v43  ;;  %v4171_v42 = vld [vmem:[%s5338_s3 + $0x5c0] sm:$0xff]   ;;  %v455_v43 = vrot.slane %v4884_v54, %v4558_v38 }
 0x1e6   :  { %3755 = vmatprep.subr.bf16.mxu0 %v4127_v44  ;;  %v4172_v44 = vld [vmem:[%s5338_s3 + $0x500] sm:$0xff]  }
 0x1e8   :  { %3734 = vmatpush3.bf16.msra.mxu1 %v4128_v45  ;;  %v463_v45 = vrot.slane %v4884_v54, %v4561_v39 }
 0x1e9   :  { %3756 = vmatpush3.bf16.msra.mxu0 %v4129_v46  ;;  %3735 = vmatprep.subr.bf16.mxu1 %v4130_v47  ;;  %v544_v46 = vpack.c.bf16 %v435_v33, %v435_v33  ;;  %v4173_v47 = vld [vmem:[%s5338_s3 + $0x580] sm:$0xff]   ;;  %v4211_v33 = vld [vmem:[%s5338_s3 + $0x6d0] sm:$0xff]  }
 0x1ea   :  { %3757 = vmatprep.subr.bf16.mxu0 %v4131_v48  ;;  %v546_v48 = vpack.c.bf16 %v443_v41, %v443_v41  ;;  %v4213_v41 = vld [vmem:[%s5338_s3 + $0x690] sm:$0xff]  }
 0x1ec   :  { %3736 = vmatpush3.bf16.msra.mxu1 %v4132_v49  ;;  %v4174_v49 = vld [vmem:[%s5338_s3 + $0x548] sm:$0xff]  }
 0x1ed   :  { %3758 = vmatpush3.bf16.msra.mxu0 %v4133_v50  ;;  %3737 = vmatprep.subr.bf16.mxu1 %v4134_v51  ;;  %v549_v50 = vpack.c.bf16 %v455_v43, %v455_v43  ;;  %v4175_v51 = vld [vmem:[%s5338_s3 + $0x5c8] sm:$0xff]   ;;  %v4215_v43 = vld [vmem:[%s5338_s3 + $0x6d8] sm:$0xff]  }
 0x1ee   :  { %3759 = vmatprep.subr.bf16.mxu0 %v4135_v52  ;;  %v551_v52 = vpack.c.bf16 %v463_v45, %v463_v45  ;;  %v4217_v45 = vld [vmem:[%s5338_s3 + $0x698] sm:$0xff]  }
 0x1f0   :  { %3738 = vmatpush3.bf16.msra.mxu1 %v4136_v53  ;;  %v4176_v53 = vld [vmem:[%s5338_s3 + $0x508] sm:$0xff]  }
 0x1f1   :  { %3760 = vmatpush3.bf16.msra.mxu0 %v4137_v57  ;;  %3767 = vmatprep.subr.bf16.mxu1 %v4138_v60  ;;  %v4177_v57 = vld [vmem:[%s5338_s3 + $0x588] sm:$0xff]   ;;  %v4179_v60 = vld [vmem:[%s5338_s3 + $0x5d0] sm:$0xff]  }
 0x1f2   :  { %3789 = vmatprep.subr.bf16.mxu0 %v4139_v61  ;;  %v4180_v61 = vld [vmem:[%s5338_s3 + $0x510] sm:$0xff]  }
 0x1f3   :  { %2882 = vmatmul.mubr.bf16.vlgmr.msra.gmra.mrb[12].mxu1 %v540_v1  ;;  %v4184_v1 = vld [vmem:[%s5338_s3 + $0x518] sm:$0xff]  }
 0x1f4   :  { %2922 = vmatmul.mubr.bf16.vlgmr.msra.gmra.mrb[16].mxu0 %v542_v3  ;;  %3768 = vmatpush3.bf16.msra.mxu1 %v4140_v63  ;;  %v4182_v63 = vld [vmem:[%s5338_s3 + $0x558] sm:$0xff]   ;;  %v4186_v3 = vld [vmem:[%s5338_s3 + $0x560] sm:$0xff]  }
 0x1f5   :  { %2961 = vmatprep.mubr.bf16.mxu1 %v545_v5  ;;  %3790 = vmatpush3.bf16.msra.mxu0 %v4141_v2  ;;  %v4185_v2 = vld [vmem:[%s5338_s3 + $0x598] sm:$0xff]   ;;  %v4188_v5 = vld [vmem:[%s5338_s3 + $0x520] sm:$0xff]  }
 0x1f6   :  { %3001 = vmatprep.mubr.bf16.mxu0 %v547_v7  ;;  %3769 = vmatprep.subr.bf16.mxu1 %v4142_v4  ;;  %v4187_v4 = vld [vmem:[%s5338_s3 + $0x5e0] sm:$0xff]   ;;  %v4190_v7 = vld [vmem:[%s5338_s3 + $0x568] sm:$0xff]  }
 0x1f7   :  { %3791 = vmatprep.subr.bf16.mxu0 %v4143_v6  ;;  %v4189_v6 = vld [vmem:[%s5338_s3 + $0x5a0] sm:$0xff]  }
 0x1f8   :  { %3770 = vmatpush3.bf16.msra.mxu1 %v4144_v8  ;;  %v4191_v8 = vld [vmem:[%s5338_s3 + $0x5e8] sm:$0xff]  }
 0x1f9   :  { %3792 = vmatpush3.bf16.msra.mxu0 %v4145_v0  ;;  %3771 = vmatprep.subr.bf16.mxu1 %v4146_v9  ;;  %v4192_v0 = vld [vmem:[%s5338_s3 + $0x528] sm:$0xff]  }
 0x1fa   :  { %3793 = vmatprep.subr.bf16.mxu0 %v4147_v10  ;;  %v4193_v9 = vld [vmem:[%s5338_s3 + $0x5a8] sm:$0xff]   ;;  %v4194_v10 = vld [vmem:[%s5338_s3 + $0x570] sm:$0xff]  }
 0x1fc   :  { %3772 = vmatpush3.bf16.msra.mxu1 %v4148_v11  ;;  %v4195_v11 = vld [vmem:[%s5338_s3 + $0x5f0] sm:$0xff]  }
 0x1fd   :  { %3794 = vmatpush3.bf16.msra.mxu0 %v4149_v12  ;;  %3773 = vmatprep.subr.bf16.mxu1 %v4150_v13  ;;  %v4196_v12 = vld [vmem:[%s5338_s3 + $0x530] sm:$0xff]  }
 0x1fe   :  { %3795 = vmatprep.subr.bf16.mxu0 %v4151_v14  ;;  %v4197_v13 = vld [vmem:[%s5338_s3 + $0x5b0] sm:$0xff]   ;;  %v4198_v14 = vld [vmem:[%s5338_s3 + $0x578] sm:$0xff]  }
 0x200   :  { %3774 = vmatpush3.bf16.msra.mxu1 %v4152_v15  ;;  %v4199_v15 = vld [vmem:[%s5338_s3 + $0x5f8] sm:$0xff]  }
 0x201   :  { %3796 = vmatpush3.bf16.msra.mxu0 %v4153_v16  ;;  %3775 = vmatprep.subr.bf16.mxu1 %v4154_v17  ;;  %v4200_v16 = vld [vmem:[%s5338_s3 + $0x538] sm:$0xff]   ;;  %v5094_v17 = vld [vmem:[#allocation2 + $0x18] sm:$0xff] }
 0x202   :  { %3797 = vmatprep.subr.bf16.mxu0 %v4155_v18  ;;  %v4201_v18 = vld [vmem:[%s5338_s3 + $0x5b8] sm:$0xff]  }
 0x204   :  { %3776 = vmatpush3.bf16.msra.mxu1 %v4156_v19  ;;  %v451_v19 = vrot.slane %v4884_v54, %v4671_v21 }
 0x205   :  { %3798 = vmatpush3.bf16.msra.mxu0 %v4157_v20  ;;  %3777 = vmatprep.subr.bf16.mxu1 %v4158_v22  ;;  %v4202_v20 = vld [vmem:[%s5338_s3 + $0x640] sm:$0xff]   ;;  %v459_v22 = vrot.slane %v4884_v54, %v4590_v56 }
 0x206   :  { %3799 = vmatprep.subr.bf16.mxu0 %v4159_v23  ;;  %v4203_v23 = vld [vmem:[%s5338_s3 + $0x6c0] sm:$0xff]  }
 0x207   :  { %v4205_v54 = vld [vmem:[%s5338_s3 + $0x680] sm:$0xff]  }
 0x208   :  { %3778 = vmatpush3.bf16.msra.mxu1 %v4160_v24  ;;  %v471_v24 = vrot.slane %v5094_v17, %v4546_v34  ;;  %v4206_v34 = vld [vmem:[%s5338_s3 + $0x648] sm:$0xff]  }
 0x209   :  { %3800 = vmatpush3.bf16.msra.mxu0 %v4161_v25  ;;  %3779 = vmatprep.subr.bf16.mxu1 %v4162_v55  ;;  %v4204_v25 = vld [vmem:[%s5338_s3 + $0x600] sm:$0xff]   ;;  %v479_v55 = vrot.slane %v5094_v17, %v4549_v35 }
 0x20a   :  { %3801 = vmatprep.subr.bf16.mxu0 %v4163_v26  ;;  %v548_v26 = vpack.c.bf16 %v451_v19, %v451_v19  ;;  %v4247_v19 = vld [vmem:[%s5338_s3 + $0x7d8] sm:$0xff]  }
 0x20b   :  { %v555_v35 = vpack.c.bf16 %v479_v55, %v479_v55  ;;  %v4253_v55 = vld [vmem:[%s5338_s3 + $0x7a0] sm:$0xff]  }
 0x20c   :  { %3780 = vmatpush3.bf16.msra.mxu1 %v4164_v27  ;;  %v550_v27 = vpack.c.bf16 %v459_v22, %v459_v22  ;;  %v4249_v22 = vld [vmem:[%s5338_s3 + $0x798] sm:$0xff]  }
 0x20d   :  { %3802 = vmatpush3.bf16.msra.mxu0 %v4165_v28  ;;  %3781 = vmatprep.subr.bf16.mxu1 %v4166_v29  ;;  %v553_v28 = vpack.c.bf16 %v471_v24, %v471_v24  ;;  %v4207_v29 = vld [vmem:[%s5338_s3 + $0x6c8] sm:$0xff]   ;;  %v4251_v24 = vld [vmem:[%s5338_s3 + $0x7e0] sm:$0xff]  }
 0x20e   :  { %3803 = vmatprep.subr.bf16.mxu0 %v4167_v30  ;;  %v4208_v30 = vld [vmem:[%s5338_s3 + $0x608] sm:$0xff]  }
 0x210   :  { %3782 = vmatpush3.bf16.msra.mxu1 %v4168_v31  ;;  %v4209_v31 = vld [vmem:[%s5338_s3 + $0x688] sm:$0xff]  }
 0x211   :  { %3804 = vmatpush3.bf16.msra.mxu0 %v4169_v32  ;;  %3811 = vmatprep.subr.bf16.mxu1 %v4170_v40  ;;  %v4210_v32 = vld [vmem:[%s5338_s3 + $0x650] sm:$0xff]  }
 0x212   :  { %3833 = vmatprep.subr.bf16.mxu0 %v4171_v42  ;;  %v4212_v40 = vld [vmem:[%s5338_s3 + $0x610] sm:$0xff]   ;;  %v4214_v42 = vld [vmem:[%s5338_s3 + $0x658] sm:$0xff]  }
 0x213   :  { %2962 = vmatmul.mubr.bf16.vlgmr.msra.gmra.mrb[16].mxu1 %v544_v46  ;;  %v4218_v46 = vld [vmem:[%s5338_s3 + $0x660] sm:$0xff]  }
 0x214   :  { %3002 = vmatmul.mubr.bf16.vlgmr.msra.gmra.mrb[20].mxu0 %v546_v48  ;;  %3812 = vmatpush3.bf16.msra.mxu1 %v4172_v44  ;;  %v4216_v44 = vld [vmem:[%s5338_s3 + $0x618] sm:$0xff]   ;;  %v4220_v48 = vld [vmem:[%s5338_s3 + $0x620] sm:$0xff]  }
 0x215   :  { %3041 = vmatprep.mubr.bf16.mxu1 %v549_v50  ;;  %3834 = vmatpush3.bf16.msra.mxu0 %v4173_v47  ;;  %v4219_v47 = vld [vmem:[%s5338_s3 + $0x6e0] sm:$0xff]   ;;  %v4222_v50 = vld [vmem:[%s5338_s3 + $0x668] sm:$0xff]  }
 0x216   :  { %3081 = vmatprep.mubr.bf16.mxu0 %v551_v52  ;;  %3813 = vmatprep.subr.bf16.mxu1 %v4174_v49  ;;  %v4221_v49 = vld [vmem:[%s5338_s3 + $0x6a0] sm:$0xff]   ;;  %v4224_v52 = vld [vmem:[%s5338_s3 + $0x628] sm:$0xff]  }
 0x217   :  { %3835 = vmatprep.subr.bf16.mxu0 %v4175_v51  ;;  %v4223_v51 = vld [vmem:[%s5338_s3 + $0x6e8] sm:$0xff]  }
 0x218   :  { %3814 = vmatpush3.bf16.msra.mxu1 %v4176_v53  ;;  %v4225_v53 = vld [vmem:[%s5338_s3 + $0x6a8] sm:$0xff]  }
 0x219   :  { %3836 = vmatpush3.bf16.msra.mxu0 %v4177_v57  ;;  %3815 = vmatprep.subr.bf16.mxu1 %v4178_v58  ;;  %v4226_v57 = vld [vmem:[%s5338_s3 + $0x670] sm:$0xff]  }
 0x21a   :  { %3837 = vmatprep.subr.bf16.mxu0 %v4179_v60  ;;  %v4227_v58 = vld [vmem:[%s5338_s3 + $0x6f0] sm:$0xff]  }
 0x21b   :  { %v4228_v60 = vld [vmem:[%s5338_s3 + $0x630] sm:$0xff]  }
 0x21c   :  { %3816 = vmatpush3.bf16.msra.mxu1 %v4180_v61  ;;  %v4229_v61 = vld [vmem:[%s5338_s3 + $0x6b0] sm:$0xff]  }
 0x21d   :  { %3838 = vmatpush3.bf16.msra.mxu0 %v4181_v62  ;;  %3817 = vmatprep.subr.bf16.mxu1 %v4182_v63  ;;  %v4230_v62 = vld [vmem:[%s5338_s3 + $0x678] sm:$0xff]  }
 0x21e   :  { %3839 = vmatprep.subr.bf16.mxu0 %v4183_v59  ;;  %v4231_v63 = vld [vmem:[%s5338_s3 + $0x6f8] sm:$0xff]  }
 0x21f   :  { %v4232_v59 = vld [vmem:[%s5338_s3 + $0x638] sm:$0xff]  }
 0x220   :  { %3818 = vmatpush3.bf16.msra.mxu1 %v4184_v1  ;;  %v4233_v1 = vld [vmem:[%s5338_s3 + $0x6b8] sm:$0xff]  }
 0x221   :  { %3840 = vmatpush3.bf16.msra.mxu0 %v4185_v2  ;;  %3819 = vmatprep.subr.bf16.mxu1 %v4186_v3  ;;  %v467_v2 = vrot.slane %v5094_v17, %v4552_v36  ;;  %v4234_v3 = vld [vmem:[%s5338_s3 + $0x740] sm:$0xff]  }
 0x222   :  { %3841 = vmatprep.subr.bf16.mxu0 %v4187_v4  ;;  %v475_v4 = vrot.slane %v5094_v17, %v4555_v37  ;;  %v4236_v36 = vld [vmem:[%s5338_s3 + $0x700] sm:$0xff]  }
 0x223   :  { %v4237_v37 = vld [vmem:[%s5338_s3 + $0x780] sm:$0xff]  }
 0x224   :  { %3820 = vmatpush3.bf16.msra.mxu1 %v4188_v5  ;;  %v4235_v5 = vld [vmem:[%s5338_s3 + $0x7c0] sm:$0xff]  }
 0x225   :  { %3842 = vmatpush3.bf16.msra.mxu0 %v4189_v6  ;;  %3821 = vmatprep.subr.bf16.mxu1 %v4190_v7  ;;  %v487_v6 = vrot.slane %v5094_v17, %v4558_v38  ;;  %v495_v7 = vrot.slane %v5094_v17, %v4561_v39  ;;  %v4238_v38 = vld [vmem:[%s5338_s3 + $0x748] sm:$0xff]  }
 0x226   :  { %3843 = vmatprep.subr.bf16.mxu0 %v4191_v8  ;;  %v552_v8 = vpack.c.bf16 %v467_v2, %v467_v2 }
 0x227   :  { %v559_v39 = vpack.c.bf16 %v495_v7, %v495_v7 }
 0x228   :  { %3822 = vmatpush3.bf16.msra.mxu1 %v4192_v0  ;;  %v554_v0 = vpack.c.bf16 %v475_v4, %v475_v4 }
 0x229   :  { %3844 = vmatpush3.bf16.msra.mxu0 %v4193_v9  ;;  %3823 = vmatprep.subr.bf16.mxu1 %v4194_v10  ;;  %v557_v9 = vpack.c.bf16 %v487_v6, %v487_v6  ;;  %v4239_v10 = vld [vmem:[%s5338_s3 + $0x7c8] sm:$0xff]  }
 0x22a   :  { %3845 = vmatprep.subr.bf16.mxu0 %v4195_v11  ;;  %v4240_v11 = vld [vmem:[%s5338_s3 + $0x708] sm:$0xff]  }
 0x22c   :  { %3824 = vmatpush3.bf16.msra.mxu1 %v4196_v12  ;;  %v4241_v12 = vld [vmem:[%s5338_s3 + $0x788] sm:$0xff]  }
 0x22d   :  { %3846 = vmatpush3.bf16.msra.mxu0 %v4197_v13  ;;  %3825 = vmatprep.subr.bf16.mxu1 %v4198_v14  ;;  %v4242_v13 = vld [vmem:[%s5338_s3 + $0x750] sm:$0xff]  }
 0x22e   :  { %3847 = vmatprep.subr.bf16.mxu0 %v4199_v15  ;;  %v4243_v14 = vld [vmem:[%s5338_s3 + $0x7d0] sm:$0xff]  }
 0x22f   :  { %v4244_v15 = vld [vmem:[%s5338_s3 + $0x710] sm:$0xff]  }
 0x230   :  { %3826 = vmatpush3.bf16.msra.mxu1 %v4200_v16  ;;  %v4245_v16 = vld [vmem:[%s5338_s3 + $0x790] sm:$0xff]  }
 0x231   :  { %3848 = vmatpush3.bf16.msra.mxu0 %v4201_v18  ;;  %3855 = vmatprep.subr.bf16.mxu1 %v4202_v20  ;;  %v4246_v18 = vld [vmem:[%s5338_s3 + $0x758] sm:$0xff]  }
 0x232   :  { %3877 = vmatprep.subr.bf16.mxu0 %v4203_v23  ;;  %v4248_v20 = vld [vmem:[%s5338_s3 + $0x718] sm:$0xff]   ;;  %v4250_v23 = vld [vmem:[%s5338_s3 + $0x760] sm:$0xff]  }
 0x233   :  { %3042 = vmatmul.mubr.bf16.vlgmr.msra.gmra.mrb[20].mxu1 %v548_v26  ;;  %v4254_v26 = vld [vmem:[%s5338_s3 + $0x768] sm:$0xff]  }
 0x234   :  { %3082 = vmatmul.mubr.bf16.vlgmr.msra.gmra.mrb[24].mxu0 %v550_v27  ;;  %3856 = vmatpush3.bf16.msra.mxu1 %v4204_v25  ;;  %v4252_v25 = vld [vmem:[%s5338_s3 + $0x720] sm:$0xff]   ;;  %v4256_v27 = vld [vmem:[%s5338_s3 + $0x728] sm:$0xff]  }
 0x235   :  { %3121 = vmatprep.mubr.bf16.mxu1 %v553_v28  ;;  %3878 = vmatpush3.bf16.msra.mxu0 %v4205_v54  ;;  %v4255_v54 = vld [vmem:[%s5338_s3 + $0x7e8] sm:$0xff]   ;;  %v4258_v28 = vld [vmem:[%s5338_s3 + $0x770] sm:$0xff]  }
 0x236   :  { %3161 = vmatprep.mubr.bf16.mxu0 %v555_v35  ;;  %3857 = vmatprep.subr.bf16.mxu1 %v4206_v34  ;;  %v4257_v34 = vld [vmem:[%s5338_s3 + $0x7a8] sm:$0xff]  }
 0x237   :  { %3879 = vmatprep.subr.bf16.mxu0 %v4207_v29 }
 0x238   :  { %3858 = vmatpush3.bf16.msra.mxu1 %v4208_v30  ;;  %v4259_v30 = vld [vmem:[%s5338_s3 + $0x7f0] sm:$0xff]  }
 0x239   :  { %3880 = vmatpush3.bf16.msra.mxu0 %v4209_v31  ;;  %3859 = vmatprep.subr.bf16.mxu1 %v4210_v32  ;;  %v1072_v31 = vld [vmem:[%s5339_s4] sm:$0x1] }
 0x23a   :  { %3881 = vmatprep.subr.bf16.mxu0 %v4211_v33 }
 0x23c   :  { %3860 = vmatpush3.bf16.msra.mxu1 %v4212_v40 }
 0x23d   :  { %3882 = vmatpush3.bf16.msra.mxu0 %v4213_v41  ;;  %3861 = vmatprep.subr.bf16.mxu1 %v4214_v42 }
 0x23e   :  { %3883 = vmatprep.subr.bf16.mxu0 %v4215_v43 }
 0x240   :  { %3862 = vmatpush3.bf16.msra.mxu1 %v4216_v44  ;;  %v4260_v44 = vld [vmem:[%s5338_s3 + $0x730] sm:$0xff]  }
 0x241   :  { %3884 = vmatpush3.bf16.msra.mxu0 %v4217_v45  ;;  %3863 = vmatprep.subr.bf16.mxu1 %v4218_v46 }
 0x242   :  { %3885 = vmatprep.subr.bf16.mxu0 %v4219_v47  ;;  %v4261_v47 = vld [vmem:[%s5338_s3 + $0x7b0] sm:$0xff]  }
 0x244   :  { %3864 = vmatpush3.bf16.msra.mxu1 %v4220_v48  ;;  %v4262_v48 = vld [vmem:[%s5338_s3 + $0x778] sm:$0xff]  }
 0x245   :  { %3886 = vmatpush3.bf16.msra.mxu0 %v4221_v49  ;;  %3865 = vmatprep.subr.bf16.mxu1 %v4222_v50  ;;  %v4263_v50 = vld [vmem:[%s5338_s3 + $0x7f8] sm:$0xff]  }
 0x246   :  { %3887 = vmatprep.subr.bf16.mxu0 %v4223_v51 }
 0x248   :  { %3866 = vmatpush3.bf16.msra.mxu1 %v4224_v52  ;;  %v4264_v52 = vld [vmem:[%s5338_s3 + $0x738] sm:$0xff]  }
 0x249   :  { %3888 = vmatpush3.bf16.msra.mxu0 %v4225_v53  ;;  %3867 = vmatprep.subr.bf16.mxu1 %v4226_v57  ;;  %v4265_v53 = vld [vmem:[%s5338_s3 + $0x7b8] sm:$0xff]   ;;  %v483_v57 = vrot.slane %v5094_v17, %v4671_v21 }
 0x24a   :  { %3889 = vmatprep.subr.bf16.mxu0 %v4227_v58  ;;  %v491_v58 = vrot.slane %v5094_v17, %v4590_v56 }
 0x24c   :  { %3868 = vmatpush3.bf16.msra.mxu1 %v4228_v60  ;;  %v556_v60 = vpack.c.bf16 %v483_v57, %v483_v57 }
 0x24d   :  { %3890 = vmatpush3.bf16.msra.mxu0 %v4229_v61  ;;  %3869 = vmatprep.subr.bf16.mxu1 %v4230_v62  ;;  %v558_v61 = vpack.c.bf16 %v491_v58, %v491_v58 }
 0x24e   :  { %3891 = vmatprep.subr.bf16.mxu0 %v4231_v63 }
 0x250   :  { %3870 = vmatpush3.bf16.msra.mxu1 %v4232_v59 }
 0x251   :  { %3892 = vmatpush3.bf16.msra.mxu0 %v4233_v1  ;;  %3899 = vmatprep.subr.bf16.mxu1 %v4234_v3 }
 0x252   :  { %3921 = vmatprep.subr.bf16.mxu0 %v4235_v5 }
 0x253   :  { %3122 = vmatmul.mubr.bf16.vlgmr.msra.gmra.mrb[24].mxu1 %v552_v8 }
 0x254   :  { %3162 = vmatmul.mubr.bf16.vlgmr.msra.gmra.mrb[28].mxu0 %v554_v0  ;;  %3900 = vmatpush3.bf16.msra.mxu1 %v4236_v36 }
 0x255   :  { %3201 = vmatprep.mubr.bf16.mxu1 %v557_v9  ;;  %3922 = vmatpush3.bf16.msra.mxu0 %v4237_v37 }
 0x256   :  { %3241 = vmatprep.mubr.bf16.mxu0 %v559_v39  ;;  %3901 = vmatprep.subr.bf16.mxu1 %v4238_v38 }
 0x257   :  { %3923 = vmatprep.subr.bf16.mxu0 %v4239_v10 }
 0x258   :  { %3902 = vmatpush3.bf16.msra.mxu1 %v4240_v11 }
 0x259   :  { %3924 = vmatpush3.bf16.msra.mxu0 %v4241_v12  ;;  %3903 = vmatprep.subr.bf16.mxu1 %v4242_v13 }
 0x25a   :  { %3925 = vmatprep.subr.bf16.mxu0 %v4243_v14 }
 0x25c   :  { %3904 = vmatpush3.bf16.msra.mxu1 %v4244_v15 }
 0x25d   :  { %3926 = vmatpush3.bf16.msra.mxu0 %v4245_v16  ;;  %3905 = vmatprep.subr.bf16.mxu1 %v4246_v18 }
 0x25e   :  { %3927 = vmatprep.subr.bf16.mxu0 %v4247_v19 }
 0x260   :  { %3906 = vmatpush3.bf16.msra.mxu1 %v4248_v20 }
 0x261   :  { %3928 = vmatpush3.bf16.msra.mxu0 %v4249_v22  ;;  %3907 = vmatprep.subr.bf16.mxu1 %v4250_v23 }
 0x262   :  { %3929 = vmatprep.subr.bf16.mxu0 %v4251_v24 }
 0x264   :  { %3908 = vmatpush3.bf16.msra.mxu1 %v4252_v25 }
 0x265   :  { %3930 = vmatpush3.bf16.msra.mxu0 %v4253_v55  ;;  %3909 = vmatprep.subr.bf16.mxu1 %v4254_v26 }
 0x266   :  { %v3607_v29 = vpop.f32.mrb[0].mxu1  ;;  %v3629_v35 = vpop.f32.mrb[4].mxu0  ;;  %3931 = vmatprep.subr.bf16.mxu0 %v4255_v54  ;;  %v4266_v54 = vld [vmem:[%s5340_s5] sm:$0xff]  }
 0x267   :  { %v3608_v32 = vpop.f32.mrb[1].mxu1  ;;  %v3630_v33 = vpop.f32.mrb[5].mxu0 }
 0x268   :  { %v3609_v40 = vadd.f32 %v3608_v32, %v3607_v29  ;;  %v3631_v41 = vadd.f32 %v3630_v33, %v3629_v35  ;;  %3910 = vmatpush3.bf16.msra.mxu1 %v4256_v27  ;;  %v3610_v42 = vpop.f32.mrb[2].mxu1  ;;  %v3632_v43 = vpop.f32.mrb[6].mxu0  ;;  %v4302_v27 = vmov 0.0  }
 0x269   :  { %3932 = vmatpush3.bf16.msra.mxu0 %v4257_v34  ;;  %v3611_v45 = vpop.f32.mrb[3].mxu1  ;;  %v3633_v46 = vpop.f32.mrb[7].mxu0  ;;  %3911 = vmatprep.subr.bf16.mxu1 %v4258_v28  ;;  %v4267_v34 = vld [vmem:[%s5340_s5 + $0x8] sm:$0xff]  }
 0x26a   :  { %v2644_v49 = vadd.f32 %v3609_v40, %v1072_v31  ;;  %3933 = vmatprep.subr.bf16.mxu0 %v4259_v30 }
 0x26c   :  { %v2684_v51 = vadd.f32 %v3631_v41, %v2644_v49  ;;  %3912 = vmatpush3.bf16.msra.mxu1 %v4260_v44 }
 0x26d   :  { %3934 = vmatpush3.bf16.msra.mxu0 %v4261_v47  ;;  %3913 = vmatprep.subr.bf16.mxu1 %v4262_v48 }
 0x26e   :  { %3935 = vmatprep.subr.bf16.mxu0 %v4263_v50 }
 0x270   :  { %3914 = vmatpush3.bf16.msra.mxu1 %v4264_v52 }
 0x271   :  { %3936 = vmatpush3.bf16.msra.mxu0 %v4265_v53  ;;  %3946 = vmatprep.subr.bf16.mxu1 %v4302_v27 }
 0x273   :  { %3202 = vmatmul.mubr.bf16.vlgmr.msra.gmra.mrb[28].mxu1 %v556_v60 }
 0x274   :  { %3242 = vmatmul.mubr.bf16.vlgmr.msra.gmra.mrb[32].mxu0 %v558_v61  ;;  %3950 = vmatprep.mubr.msk.bf16.mxu1 %vm4303_vm12, %v4302_v27 }
 0x275   :  { %3947 = vmatpush3.bf16.msra.mxu1 %v4266_v54 }
 0x276   :  { %3948 = vmatprep.subr.bf16.mxu1 %v4302_v27 }
 0x279   :  { %3949 = vmatpush3.bf16.msra.mxu1 %v4267_v34 }
 0x286   :  { %v3651_v62 = vpop.f32.mrb[4].mxu1  ;;  %v3673_v63 = vpop.f32.mrb[8].mxu0 }
 0x287   :  { %v3652_v59 = vpop.f32.mrb[5].mxu1  ;;  %v3674_v1 = vpop.f32.mrb[9].mxu0 }
 0x288   :  { %v3653_v2 = vadd.f32 %v3652_v59, %v3651_v62  ;;  %v3675_v3 = vadd.f32 %v3674_v1, %v3673_v63  ;;  %v3654_v4 = vpop.f32.mrb[6].mxu1  ;;  %v3676_v5 = vpop.f32.mrb[10].mxu0 }
 0x289   :  { %v3655_v6 = vpop.f32.mrb[7].mxu1  ;;  %v3677_v21 = vpop.f32.mrb[11].mxu0 }
 0x28a   :  { %v2724_v36 = vadd.f32 %v3653_v2, %v2684_v51 }
 0x28c   :  { %v2764_v7 = vadd.f32 %v3675_v3, %v2724_v36 }
 0x2a6   :  { %v3695_v8 = vpop.f32.mrb[8].mxu1 }
 0x2a7   :  { %v3717_v56 = vpop.f32.mrb[12].mxu0  ;;  %v3696_v17 = vpop.f32.mrb[9].mxu1 }
 0x2a8   :  { %v3697_v37 = vadd.f32 %v3696_v17, %v3695_v8  ;;  %v3718_v0 = vpop.f32.mrb[13].mxu0  ;;  %v3698_v38 = vpop.f32.mrb[10].mxu1 }
 0x2a9   :  { %v3719_v9 = vadd.f32 %v3718_v0, %v3717_v56  ;;  %v3720_v10 = vpop.f32.mrb[14].mxu0  ;;  %v3699_v39 = vpop.f32.mrb[11].mxu1 }
 0x2aa   :  { %v2804_v11 = vadd.f32 %v3697_v37, %v2764_v7  ;;  %v3721_v12 = vpop.f32.mrb[15].mxu0 }
 0x2ac   :  { %v2844_v13 = vadd.f32 %v3719_v9, %v2804_v11 }
 0x2c6   :  { %v3739_v14 = vpop.f32.mrb[12].mxu1 }
 0x2c7   :  { %v3761_v15 = vpop.f32.mrb[16].mxu0  ;;  %v3740_v16 = vpop.f32.mrb[13].mxu1 }
 0x2c8   :  { %v3741_v18 = vadd.f32 %v3740_v16, %v3739_v14  ;;  %v3762_v19 = vpop.f32.mrb[17].mxu0  ;;  %v3742_v20 = vpop.f32.mrb[14].mxu1 }
 0x2c9   :  { %v3763_v22 = vadd.f32 %v3762_v19, %v3761_v15  ;;  %v3764_v23 = vpop.f32.mrb[18].mxu0  ;;  %v3743_v24 = vpop.f32.mrb[15].mxu1  ;;  %v3255_v15 = vld [vmem:[%s5341_s6] sm:$0x1] }
 0x2ca   :  { %v2884_v25 = vadd.f32 %v3741_v18, %v2844_v13  ;;  %v3765_v55 = vpop.f32.mrb[19].mxu0 }
 0x2cc   :  { %v2924_v26 = vadd.f32 %v3763_v22, %v2884_v25 }
 0x2e6   :  { %v3783_v28 = vpop.f32.mrb[16].mxu1 }
 0x2e7   :  { %v3805_v29 = vpop.f32.mrb[20].mxu0  ;;  %v3784_v35 = vpop.f32.mrb[17].mxu1 }
 0x2e8   :  { %v3785_v30 = vadd.f32 %v3784_v35, %v3783_v28  ;;  %v3806_v31 = vpop.f32.mrb[21].mxu0  ;;  %v3786_v32 = vpop.f32.mrb[18].mxu1 }
 0x2e9   :  { %v3807_v33 = vadd.f32 %v3806_v31, %v3805_v29  ;;  %v3808_v40 = vpop.f32.mrb[22].mxu0  ;;  %v3787_v41 = vpop.f32.mrb[19].mxu1 }
 0x2ea   :  { %v2964_v42 = vadd.f32 %v3785_v30, %v2924_v26  ;;  %v3809_v43 = vpop.f32.mrb[23].mxu0 }
 0x2ec   :  { %v3004_v44 = vadd.f32 %v3807_v33, %v2964_v42 }
 0x306   :  { %v3827_v45 = vpop.f32.mrb[20].mxu1 }
 0x307   :  { %v3849_v46 = vpop.f32.mrb[24].mxu0  ;;  %v3828_v47 = vpop.f32.mrb[21].mxu1 }
 0x308   :  { %v3829_v48 = vadd.f32 %v3828_v47, %v3827_v45  ;;  %v3850_v49 = vpop.f32.mrb[25].mxu0  ;;  %v3830_v50 = vpop.f32.mrb[22].mxu1 }
 0x309   :  { %v3851_v51 = vadd.f32 %v3850_v49, %v3849_v46  ;;  %v3852_v52 = vpop.f32.mrb[26].mxu0  ;;  %v3831_v53 = vpop.f32.mrb[23].mxu1 }
 0x30a   :  { %v3044_v57 = vadd.f32 %v3829_v48, %v3004_v44  ;;  %v3853_v58 = vpop.f32.mrb[27].mxu0 }
 0x30c   :  { %v3084_v60 = vadd.f32 %v3851_v51, %v3044_v57 }
 0x326   :  { %v3871_v61 = vpop.f32.mrb[24].mxu1 }
 0x327   :  { %v3893_v62 = vpop.f32.mrb[28].mxu0  ;;  %v3872_v63 = vpop.f32.mrb[25].mxu1 }
 0x328   :  { %v3873_v59 = vadd.f32 %v3872_v63, %v3871_v61  ;;  %v3894_v1 = vpop.f32.mrb[29].mxu0  ;;  %v3874_v2 = vpop.f32.mrb[26].mxu1 }
 0x329   :  { %v3895_v3 = vadd.f32 %v3894_v1, %v3893_v62  ;;  %v3896_v4 = vpop.f32.mrb[30].mxu0  ;;  %v3875_v5 = vpop.f32.mrb[27].mxu1 }
 0x32a   :  { %v3124_v6 = vadd.f32 %v3873_v59, %v3084_v60  ;;  %v3897_v21 = vpop.f32.mrb[31].mxu0 }
 0x32c   :  { %v3164_v36 = vadd.f32 %v3895_v3, %v3124_v6 }
 0x346   :  { %v3915_v7 = vpop.f32.mrb[28].mxu1 }
 0x347   :  { %v3937_v8 = vpop.f32.mrb[32].mxu0  ;;  %v3916_v56 = vpop.f32.mrb[29].mxu1 }
 0x348   :  { %v3917_v17 = vadd.f32 %v3916_v56, %v3915_v7  ;;  %v3938_v37 = vpop.f32.mrb[33].mxu0  ;;  %v3918_v0 = vpop.f32.mrb[30].mxu1 }
 0x349   :  { %v3939_v38 = vadd.f32 %v3938_v37, %v3937_v8  ;;  %v3940_v9 = vpop.f32.mrb[34].mxu0  ;;  %v3919_v10 = vpop.f32.mrb[31].mxu1 }
 0x34a   :  { %v3204_v39 = vadd.f32 %v3917_v17, %v3164_v36  ;;  %v3941_v11 = vpop.f32.mrb[35].mxu0 }
 0x34c   :  { %v3244_v12 = vadd.f32 %v3939_v38, %v3204_v39 }
 0x34e   :  { %v3249_v13 = vmax.f32 %v3244_v12, 0.0 }
 0x350   :  { %v3250_v14 = vpack.c.bf16 %v3249_v13, %v3249_v13 }
 0x352   :  { %3951 = vmatmul.mubr.msk.bf16.vlgmr.msra.gmra.mrb[32].mxu1 %vm3268_vm13, %v3250_v14 }
 0x425   :  { %v3306_v16 = vpop.f32.mrb[32].mxu1 }
 0x426   :  { %v3307_v18 = vadd.f32 %v3306_v16, %v3255_v15  ;;  %v3952_v19 = vpop.f32.mrb[33].mxu1 }
 0x427   :  { %v3309_v20 = vpop.f32.mrb[34].mxu1 }
 0x428   :  { %v3312_v22 = vmax.f32 %v3307_v18, 0.0  ;;  %v3953_v23 = vpop.f32.mrb[35].mxu1 }
 0x42a   :  { %3314 = vst.msk [vmem:[#allocation3] sm:$0x1] %vm3313_vm14, %v3312_v22 }
 0x42b   :  { %4279 = shalt.err (!%p4276_p4)
}
 0x42c   :  { %s4280_s20 = scalar_lea.hbm %s5342_s7, 16 }
 0x42d   :  { %p4281_p5 = scmp.ne.s32.totalorder %s5342_s7, %s4280_s20  ;;  %p4284_p6 = scmp.lt.u32.totalorder %s4280_s20, %s5342_s7 }
 0x42f   :  { %p4286_p7 = pnand %p4284_p6, %p4281_p5 }
 0x431   :  { %4289 = shalt.err (!%p4286_p7)
}
 0x432   :  { %3324 = dma.vmem_to_hbm [thread:$0]  %s3322_s16, 16, %s5342_s7, [#allocation4]  }
 0x433   :  { %4290 = dma.done.wait [#allocation4], 16  }
 0x434   :  { %4291 = vsyncadd [#allocation4], 4294967280 }
 0x435   :  { %3328 = vsyncpa [#allocation4], 1 }

</bundles_post_ra>
